<compile_context>
chip_gen: v7x
topology: tpu7x:2x2x1
jax: 0.10.0
libtpu: 0.0.40
codegen_flags: <defaults>
</compile_context>

<pallas_src>
import jax
import jax.numpy as jnp
import numpy as np
from jax.experimental import pallas as pl
from jax.experimental.pallas import tpu as pltpu


# ----------------------------- Pallas kernel ------------------------------ #
def decoder_kernel(
    tok_ref,        # (B,)  int32, SMEM (scalar prefetch)
    emb_hbm_ref,    # (V, E)        HBM (pl.ANY)
    h_ref,          # (B, H)        VMEM
    enc_ref,        # (B, S, 2E)    VMEM
    attn_wh_ref,    # (H, A)
    attn_we_ref,    # (2E, A)
    attn_b_ref,     # (1, A)
    w_ih_ref,       # (E+2E, 3H)    fused GRU input weights
    b_ih_ref,       # (1, 3H)
    w_hh_ref,       # (H, 3H)
    b_hh_ref,       # (1, 3H)
    w_out_ref,      # (H+2E+E, TILE_V)  vocab tile j
    b_out_ref,      # (1, TILE_V)
    logits_ref,     # (B, TILE_V)   out (vocab tile j)
    hnew_ref,       # (B, H)        out (resident across the grid)
    emb_vmem,       # (B, E)        scratch
    act_vmem,       # (B, H+2E+E)   scratch
    gather_sem,     # DMA semaphores (B,)
):
    j = pl.program_id(0)

    # ---- shared (vocab-independent) work: run once at grid step 0 ---------
    @pl.when(j == 0)
    def _shared():
        B, H = h_ref.shape
        S = enc_ref.shape[1]
        twoE = enc_ref.shape[2]

        # 1. embedding lookup as a true gather: B row DMAs HBM -> VMEM.
        #    (nn.Dropout is identity in eval / inference mode.)
        copies = []
        for b in range(B):
            cp = pltpu.make_async_copy(
                emb_hbm_ref.at[pl.ds(tok_ref[b], 1), :],
                emb_vmem.at[pl.ds(b, 1), :],
                gather_sem.at[b],
            )
            cp.start()
            copies.append(cp)
        for cp in copies:
            cp.wait()
        emb = emb_vmem[...]                                         # (B, E)

        h = h_ref[...]                                              # (B, H)
        enc = enc_ref[...]                                          # (B, S, 2E)

        # 2. attention scores.
        h_proj = jnp.dot(h, attn_wh_ref[...],
                         preferred_element_type=jnp.float32)        # (B, A)
        e_proj = jnp.dot(enc.reshape(B * S, twoE), attn_we_ref[...],
                         preferred_element_type=jnp.float32)        # (B*S, A)
        A = h_proj.shape[-1]
        energy = jnp.tanh(e_proj.reshape(B, S, A)
                          + h_proj[:, None, :]
                          + attn_b_ref[...][None, :, :])            # (B, S, A)
        scores = jnp.sum(energy, axis=-1)                           # (B, S)
        scores = scores - jnp.max(scores, axis=-1, keepdims=True)
        ex = jnp.exp(scores)
        denom = jnp.sum(ex, axis=-1, keepdims=True)                 # (B, 1)
        a = ex * pl.reciprocal(denom, approx=True)                  # softmax over S

        # 3. weighted encoder representation: batched MXU contraction over S.
        weighted = jnp.einsum("bqs,bse->bqe", a[:, None, :], enc,
                              preferred_element_type=jnp.float32)[:, 0, :]   # (B, 2E)

        # 4. GRU cell (PyTorch gate order r, z, n); fused input matmul.
        x = jnp.concatenate([emb, weighted], axis=1)                # (B, E+2E)
        gi = jnp.dot(x, w_ih_ref[...],
                     preferred_element_type=jnp.float32) + b_ih_ref[...]     # (B, 3H)
        gh = jnp.dot(h, w_hh_ref[...],
                     preferred_element_type=jnp.float32) + b_hh_ref[...]     # (B, 3H)
        r = jax.nn.sigmoid(gi[:, :H] + gh[:, :H])
        z = jax.nn.sigmoid(gi[:, H:2 * H] + gh[:, H:2 * H])
        n = jnp.tanh(gi[:, 2 * H:] + r * gh[:, 2 * H:])
        h_new = (1.0 - z) * n + z * h                               # (B, H)

        hnew_ref[...] = h_new
        # stash fused output-projection activation [h_new | weighted | emb].
        act_vmem[...] = jnp.concatenate([h_new, weighted, emb], axis=1)

    # ---- 5. output projection for vocab tile j (every grid step) ----------
    logits_ref[...] = (
        jnp.dot(act_vmem[...], w_out_ref[...],
                preferred_element_type=jnp.float32)
        + b_out_ref[...])


# ------------------------- one-time weight plumbing ------------------------ #
def prepare_decoder_params(params):
    """Split / transpose PyTorch-layout weights ONCE (hoisted out of the decode step)."""
    H = params["W_hh"].shape[1]
    return {
        "emb":     params["emb"],                        # (V, E)
        "attn_wh": params["attn_W"][:, :H].T,            # (H, A)
        "attn_we": params["attn_W"][:, H:].T,            # (2E, A)
        "attn_b":  params["attn_b"].reshape(1, -1),      # (1, A)
        "w_ih":    params["W_ih"].T,                     # (E+2E, 3H)
        "b_ih":    params["b_ih"].reshape(1, -1),        # (1, 3H)
        "w_hh":    params["W_hh"].T,                     # (H, 3H)
        "b_hh":    params["b_hh"].reshape(1, -1),        # (1, 3H)
        "w_out":   params["W_out"].T,                    # (H+2E+E, V)
        "b_out":   params["b_out"].reshape(1, -1),       # (1, V)
    }


# ------------------------------ JAX wrapper -------------------------------- #
@jax.jit
def decoder_forward(tokens, decoder_hidden, encoder_outputs_bse, prep):
    """One decode step.

    tokens:              (B,)        int32
    decoder_hidden:      (B, H)      f32
    encoder_outputs_bse: (B, S, 2E)  f32  (batch-major; permuted ONCE before the decode loop)
    prep:                dict from prepare_decoder_params (built ONCE).
    """
    B = tokens.shape[0]
    H = decoder_hidden.shape[1]
    _, S, twoE = encoder_outputs_bse.shape
    V, E = prep["emb"].shape
    A = prep["attn_b"].shape[1]

    TILE_V = 128 if V % 128 == 0 else V
    n_v_tiles = V // TILE_V

    vmem = pl.BlockSpec(memory_space=pltpu.MemorySpace.VMEM)

    # rough cost estimate so XLA schedules the custom call sensibly inside a decode loop.
    flops = 2 * B * (H * A + S * twoE * A + S * twoE
                     + (E + twoE) * 3 * H + H * 3 * H
                     + (H + twoE + E) * V)
    transcendentals = B * (S * A + S + 3 * H)
    bytes_accessed = 4 * (B * E + 2 * B * H + B * S * twoE
                          + (H + twoE) * A + A
                          + (E + twoE) * 3 * H + H * 3 * H + 6 * H
                          + (H + twoE + E + 1) * V + B * V)

    grid_spec = pltpu.PrefetchScalarGridSpec(
        num_scalar_prefetch=1,                          # tokens land in SMEM
        grid=(n_v_tiles,),                              # vocab tiling of the output projection
        in_specs=[
            pl.BlockSpec(memory_space=pl.ANY),          # embedding table stays in HBM
            vmem,                                       # decoder_hidden
            vmem,                                       # encoder outputs (B, S, 2E)
            vmem, vmem, vmem,                           # attn_wh, attn_we, attn_b
            vmem, vmem, vmem, vmem,                     # w_ih, b_ih, w_hh, b_hh
            pl.BlockSpec((H + twoE + E, TILE_V), lambda j, tok: (0, j)),  # W_out tile
            pl.BlockSpec((1, TILE_V), lambda j, tok: (0, j)),             # b_out tile
        ],
        out_specs=(
            pl.BlockSpec((B, TILE_V), lambda j, tok: (0, j)),   # lane-dense logits tile
            pl.BlockSpec((B, H), lambda j, tok: (0, 0)),        # h_new, resident across grid
        ),
        scratch_shapes=[
            pltpu.VMEM((B, E), jnp.float32),                    # gathered embeddings
            pltpu.VMEM((B, H + twoE + E), jnp.float32),         # fused projection activation
            pltpu.SemaphoreType.DMA((B,)),                      # gather semaphores
        ],
    )

    logits, h_new = pl.pallas_call(
        decoder_kernel,
        out_shape=(
            jax.ShapeDtypeStruct((B, V), jnp.float32),
            jax.ShapeDtypeStruct((B, H), jnp.float32),
        ),
        grid_spec=grid_spec,
        compiler_params=pltpu.CompilerParams(
            dimension_semantics=("arbitrary",),
            vmem_limit_bytes=64 * 1024 * 1024,
        ),
        cost_estimate=pl.CostEstimate(
            flops=flops,
            transcendentals=transcendentals,
            bytes_accessed=bytes_accessed),
    )(
        tokens.astype(jnp.int32),
        prep["emb"],
        decoder_hidden,
        encoder_outputs_bse,
        prep["attn_wh"], prep["attn_we"], prep["attn_b"],
        prep["w_ih"], prep["b_ih"], prep["w_hh"], prep["b_hh"],
        prep["w_out"], prep["b_out"],
    )
    return logits, h_new


# --------------------------- pure-JAX reference ----------------------------- #
def decoder_ref(tokens, decoder_hidden, encoder_outputs, p):
    emb = p["emb"][tokens]                                          # (B, E)
    S = encoder_outputs.shape[0]
    H = decoder_hidden.shape[1]
    rep_h = jnp.repeat(decoder_hidden[:, None, :], S, axis=1)       # (B, S, H)
    enc_p = jnp.transpose(encoder_outputs, (1, 0, 2))               # (B, S, 2E)
    energy = jnp.tanh(jnp.concatenate([rep_h, enc_p], axis=2) @ p["attn_W"].T + p["attn_b"])
    a = jax.nn.softmax(energy.sum(-1), axis=1)                      # (B, S)
    weighted = jnp.einsum("bs,bse->be", a, enc_p)                   # (B, 2E)
    x = jnp.concatenate([emb, weighted], axis=1)
    gi = x @ p["W_ih"].T + p["b_ih"]
    gh = decoder_hidden @ p["W_hh"].T + p["b_hh"]
    r = jax.nn.sigmoid(gi[:, :H] + gh[:, :H])
    z = jax.nn.sigmoid(gi[:, H:2 * H] + gh[:, H:2 * H])
    n = jnp.tanh(gi[:, 2 * H:] + r * gh[:, 2 * H:])
    h_new = (1 - z) * n + z * decoder_hidden
    logits = jnp.concatenate([h_new, weighted, emb], axis=1) @ p["W_out"].T + p["b_out"]
    return logits, h_new


# ----------------------------------- main ----------------------------------- #
if __name__ == "__main__":
    # small but lane/sublane-friendly sizes: vocab multiple of 128, batch fills 8 sublanes.
    V, E, ENC_H, DEC_H, A, S, B = 256, 32, 32, 64, 32, 16, 8
    TWO_E = 2 * ENC_H
    ATTN_IN = TWO_E + DEC_H          # attention.attn_in
    GRU_IN = TWO_E + E               # rnn input size

    key = jax.random.PRNGKey(0)
    ks = jax.random.split(key, 12)

    params = {
        "emb":    jax.random.normal(ks[0], (V, E), jnp.float32) * 0.1,
        "attn_W": jax.random.normal(ks[1], (A, ATTN_IN), jnp.float32) * 0.1,
        "attn_b": jax.random.normal(ks[2], (A,), jnp.float32) * 0.1,
        "W_ih":   jax.random.normal(ks[3], (3 * DEC_H, GRU_IN), jnp.float32) * 0.1,
        "W_hh":   jax.random.normal(ks[4], (3 * DEC_H, DEC_H), jnp.float32) * 0.1,
        "b_ih":   jax.random.normal(ks[5], (3 * DEC_H,), jnp.float32) * 0.1,
        "b_hh":   jax.random.normal(ks[6], (3 * DEC_H,), jnp.float32) * 0.1,
        "W_out":  jax.random.normal(ks[7], (V, ATTN_IN + E), jnp.float32) * 0.1,
        "b_out":  jax.random.normal(ks[8], (V,), jnp.float32) * 0.1,
    }

    tokens = jax.random.randint(ks[9], (B,), 0, V, jnp.int32)
    decoder_hidden = jax.random.normal(ks[10], (B, DEC_H), jnp.float32)
    encoder_outputs = jax.random.normal(ks[11], (S, B, TWO_E), jnp.float32)  # PyTorch (S, B, 2*enc_hid)

    # one-time glue before the decode loop (hoisted out of the per-step path):
    prep = prepare_decoder_params(params)
    enc_bse = jnp.transpose(encoder_outputs, (1, 0, 2))             # (B, S, 2E), done once

    logits, h_new = decoder_forward(tokens, decoder_hidden, enc_bse, prep)
    jax.block_until_ready((logits, h_new))

    ref_logits, ref_h = decoder_ref(tokens, decoder_hidden, encoder_outputs, params)
    np.testing.assert_allclose(np.asarray(logits), np.asarray(ref_logits), rtol=2e-3, atol=2e-3)
    np.testing.assert_allclose(np.asarray(h_new), np.asarray(ref_h), rtol=2e-3, atol=2e-3)

    print("KERNEL_OK")
</pallas_src>

<mosaic_0001>
module attributes {stable_mosaic.version = 11 : i64} {
  func.func @decoder_kernel(%arg0: i32, %arg1: memref<8xi32, #tpu.memory_space<smem>>, %arg2: memref<256x32xf32, #tpu.memory_space<any>>, %arg3: memref<8x64xf32, #tpu.memory_space<vmem>>, %arg4: memref<8x16x64xf32, #tpu.memory_space<vmem>>, %arg5: memref<64x32xf32, #tpu.memory_space<vmem>>, %arg6: memref<64x32xf32, #tpu.memory_space<vmem>>, %arg7: memref<1x32xf32, #tpu.memory_space<vmem>>, %arg8: memref<96x192xf32, #tpu.memory_space<vmem>>, %arg9: memref<1x192xf32, #tpu.memory_space<vmem>>, %arg10: memref<64x192xf32, #tpu.memory_space<vmem>>, %arg11: memref<1x192xf32, #tpu.memory_space<vmem>>, %arg12: memref<160x128xf32, #tpu.memory_space<vmem>>, %arg13: memref<1x128xf32, #tpu.memory_space<vmem>>, %arg14: memref<8x128xf32, #tpu.memory_space<vmem>>, %arg15: memref<8x64xf32, #tpu.memory_space<vmem>>, %arg16: memref<8x32xf32, #tpu.memory_space<vmem>>, %arg17: memref<8x160xf32, #tpu.memory_space<vmem>>, %arg18: memref<8x!tpu.dma_semaphore, #tpu.memory_space<semaphore_mem>>) attributes {dimension_semantics = [#tpu.dimension_semantics<arbitrary>], iteration_bounds = array<i64: 2>, scalar_prefetch = 1 : i64, scratch_operands = 3 : i64, tpu.core_type = #tpu.core_type<tc>, window_params = [{}, {pipeline_mode = #tpu.pipeline_mode<synchronous>, transform_indices = @transform_1, window_bounds = array<i64: 8, 64>}, {pipeline_mode = #tpu.pipeline_mode<synchronous>, transform_indices = @transform_2, window_bounds = array<i64: 8, 16, 64>}, {pipeline_mode = #tpu.pipeline_mode<synchronous>, transform_indices = @transform_3, window_bounds = array<i64: 64, 32>}, {pipeline_mode = #tpu.pipeline_mode<synchronous>, transform_indices = @transform_4, window_bounds = array<i64: 64, 32>}, {pipeline_mode = #tpu.pipeline_mode<synchronous>, transform_indices = @transform_5, window_bounds = array<i64: 1, 32>}, {pipeline_mode = #tpu.pipeline_mode<synchronous>, transform_indices = @transform_6, window_bounds = array<i64: 96, 192>}, {pipeline_mode = #tpu.pipeline_mode<synchronous>, transform_indices = @transform_7, window_bounds = array<i64: 1, 192>}, {pipeline_mode = #tpu.pipeline_mode<synchronous>, transform_indices = @transform_8, window_bounds = array<i64: 64, 192>}, {pipeline_mode = #tpu.pipeline_mode<synchronous>, transform_indices = @transform_9, window_bounds = array<i64: 1, 192>}, {transform_indices = @transform_10, window_bounds = array<i64: 160, 128>}, {transform_indices = @transform_11, window_bounds = array<i64: 1, 128>}, {transform_indices = @transform_12, window_bounds = array<i64: 8, 128>}, {pipeline_mode = #tpu.pipeline_mode<synchronous>, transform_indices = @transform_13, window_bounds = array<i64: 8, 64>}]} {
    %c0_i32 = arith.constant 0 : i32
    %0 = arith.cmpi eq, %arg0, %c0_i32 : i32
    %1 = arith.extui %0 : i1 to i32
    %c0_i32_0 = arith.constant 0 : i32
    %2 = arith.cmpi ne, %1, %c0_i32_0 : i32
    scf.if %2 {
      %c0_8 = arith.constant 0 : index
      %10 = memref.load %arg1[%c0_8] : memref<8xi32, #tpu.memory_space<smem>>
      %c0_i32_9 = arith.constant 0 : i32
      %c0_i32_10 = arith.constant 0 : i32
      %11 = tpu.memref_slice %arg2[%10, %c0_i32_10] : memref<256x32xf32, #tpu.memory_space<any>> -> memref<1x32xf32, #tpu.memory_space<any>>
      %c0_i32_11 = arith.constant 0 : i32
      %c0_i32_12 = arith.constant 0 : i32
      %12 = tpu.memref_slice %arg16[%c0_i32_11, %c0_i32_12] : memref<8x32xf32, #tpu.memory_space<vmem>> -> memref<1x32xf32, #tpu.memory_space<vmem>>
      %13 = tpu.memref_slice %arg18[%c0_i32_9] : memref<8x!tpu.dma_semaphore, #tpu.memory_space<semaphore_mem>> -> memref<1x!tpu.dma_semaphore, #tpu.memory_space<semaphore_mem>>
      %14 = tpu.memref_squeeze %13 : memref<1x!tpu.dma_semaphore, #tpu.memory_space<semaphore_mem>> -> memref<!tpu.dma_semaphore, #tpu.memory_space<semaphore_mem>>
      tpu.enqueue_dma source(%11 : memref<1x32xf32, #tpu.memory_space<any>>) target(%12 : memref<1x32xf32, #tpu.memory_space<vmem>>) target_semaphore(%14 : memref<!tpu.dma_semaphore, #tpu.memory_space<semaphore_mem>>)
      %c1 = arith.constant 1 : index
      %15 = memref.load %arg1[%c1] : memref<8xi32, #tpu.memory_space<smem>>
      %c1_i32 = arith.constant 1 : i32
      %c0_i32_13 = arith.constant 0 : i32
      %16 = tpu.memref_slice %arg2[%15, %c0_i32_13] : memref<256x32xf32, #tpu.memory_space<any>> -> memref<1x32xf32, #tpu.memory_space<any>>
      %c1_i32_14 = arith.constant 1 : i32
      %c0_i32_15 = arith.constant 0 : i32
      %17 = tpu.memref_slice %arg16[%c1_i32_14, %c0_i32_15] : memref<8x32xf32, #tpu.memory_space<vmem>> -> memref<1x32xf32, #tpu.memory_space<vmem>>
      %18 = tpu.memref_slice %arg18[%c1_i32] : memref<8x!tpu.dma_semaphore, #tpu.memory_space<semaphore_mem>> -> memref<1x!tpu.dma_semaphore, #tpu.memory_space<semaphore_mem>>
      %19 = tpu.memref_squeeze %18 : memref<1x!tpu.dma_semaphore, #tpu.memory_space<semaphore_mem>> -> memref<!tpu.dma_semaphore, #tpu.memory_space<semaphore_mem>>
      tpu.enqueue_dma source(%16 : memref<1x32xf32, #tpu.memory_space<any>>) target(%17 : memref<1x32xf32, #tpu.memory_space<vmem>>) target_semaphore(%19 : memref<!tpu.dma_semaphore, #tpu.memory_space<semaphore_mem>>)
      %c2 = arith.constant 2 : index
      %20 = memref.load %arg1[%c2] : memref<8xi32, #tpu.memory_space<smem>>
      %c2_i32 = arith.constant 2 : i32
      %c0_i32_16 = arith.constant 0 : i32
      %21 = tpu.memref_slice %arg2[%20, %c0_i32_16] : memref<256x32xf32, #tpu.memory_space<any>> -> memref<1x32xf32, #tpu.memory_space<any>>
      %c2_i32_17 = arith.constant 2 : i32
      %c0_i32_18 = arith.constant 0 : i32
      %22 = tpu.memref_slice %arg16[%c2_i32_17, %c0_i32_18] : memref<8x32xf32, #tpu.memory_space<vmem>> -> memref<1x32xf32, #tpu.memory_space<vmem>>
      %23 = tpu.memref_slice %arg18[%c2_i32] : memref<8x!tpu.dma_semaphore, #tpu.memory_space<semaphore_mem>> -> memref<1x!tpu.dma_semaphore, #tpu.memory_space<semaphore_mem>>
      %24 = tpu.memref_squeeze %23 : memref<1x!tpu.dma_semaphore, #tpu.memory_space<semaphore_mem>> -> memref<!tpu.dma_semaphore, #tpu.memory_space<semaphore_mem>>
      tpu.enqueue_dma source(%21 : memref<1x32xf32, #tpu.memory_space<any>>) target(%22 : memref<1x32xf32, #tpu.memory_space<vmem>>) target_semaphore(%24 : memref<!tpu.dma_semaphore, #tpu.memory_space<semaphore_mem>>)
      %c3 = arith.constant 3 : index
      %25 = memref.load %arg1[%c3] : memref<8xi32, #tpu.memory_space<smem>>
      %c3_i32 = arith.constant 3 : i32
      %c0_i32_19 = arith.constant 0 : i32
      %26 = tpu.memref_slice %arg2[%25, %c0_i32_19] : memref<256x32xf32, #tpu.memory_space<any>> -> memref<1x32xf32, #tpu.memory_space<any>>
      %c3_i32_20 = arith.constant 3 : i32
      %c0_i32_21 = arith.constant 0 : i32
      %27 = tpu.memref_slice %arg16[%c3_i32_20, %c0_i32_21] : memref<8x32xf32, #tpu.memory_space<vmem>> -> memref<1x32xf32, #tpu.memory_space<vmem>>
      %28 = tpu.memref_slice %arg18[%c3_i32] : memref<8x!tpu.dma_semaphore, #tpu.memory_space<semaphore_mem>> -> memref<1x!tpu.dma_semaphore, #tpu.memory_space<semaphore_mem>>
      %29 = tpu.memref_squeeze %28 : memref<1x!tpu.dma_semaphore, #tpu.memory_space<semaphore_mem>> -> memref<!tpu.dma_semaphore, #tpu.memory_space<semaphore_mem>>
      tpu.enqueue_dma source(%26 : memref<1x32xf32, #tpu.memory_space<any>>) target(%27 : memref<1x32xf32, #tpu.memory_space<vmem>>) target_semaphore(%29 : memref<!tpu.dma_semaphore, #tpu.memory_space<semaphore_mem>>)
      %c4 = arith.constant 4 : index
      %30 = memref.load %arg1[%c4] : memref<8xi32, #tpu.memory_space<smem>>
      %c4_i32 = arith.constant 4 : i32
      %c0_i32_22 = arith.constant 0 : i32
      %31 = tpu.memref_slice %arg2[%30, %c0_i32_22] : memref<256x32xf32, #tpu.memory_space<any>> -> memref<1x32xf32, #tpu.memory_space<any>>
      %c4_i32_23 = arith.constant 4 : i32
      %c0_i32_24 = arith.constant 0 : i32
      %32 = tpu.memref_slice %arg16[%c4_i32_23, %c0_i32_24] : memref<8x32xf32, #tpu.memory_space<vmem>> -> memref<1x32xf32, #tpu.memory_space<vmem>>
      %33 = tpu.memref_slice %arg18[%c4_i32] : memref<8x!tpu.dma_semaphore, #tpu.memory_space<semaphore_mem>> -> memref<1x!tpu.dma_semaphore, #tpu.memory_space<semaphore_mem>>
      %34 = tpu.memref_squeeze %33 : memref<1x!tpu.dma_semaphore, #tpu.memory_space<semaphore_mem>> -> memref<!tpu.dma_semaphore, #tpu.memory_space<semaphore_mem>>
      tpu.enqueue_dma source(%31 : memref<1x32xf32, #tpu.memory_space<any>>) target(%32 : memref<1x32xf32, #tpu.memory_space<vmem>>) target_semaphore(%34 : memref<!tpu.dma_semaphore, #tpu.memory_space<semaphore_mem>>)
      %c5 = arith.constant 5 : index
      %35 = memref.load %arg1[%c5] : memref<8xi32, #tpu.memory_space<smem>>
      %c5_i32 = arith.constant 5 : i32
      %c0_i32_25 = arith.constant 0 : i32
      %36 = tpu.memref_slice %arg2[%35, %c0_i32_25] : memref<256x32xf32, #tpu.memory_space<any>> -> memref<1x32xf32, #tpu.memory_space<any>>
      %c5_i32_26 = arith.constant 5 : i32
      %c0_i32_27 = arith.constant 0 : i32
      %37 = tpu.memref_slice %arg16[%c5_i32_26, %c0_i32_27] : memref<8x32xf32, #tpu.memory_space<vmem>> -> memref<1x32xf32, #tpu.memory_space<vmem>>
      %38 = tpu.memref_slice %arg18[%c5_i32] : memref<8x!tpu.dma_semaphore, #tpu.memory_space<semaphore_mem>> -> memref<1x!tpu.dma_semaphore, #tpu.memory_space<semaphore_mem>>
      %39 = tpu.memref_squeeze %38 : memref<1x!tpu.dma_semaphore, #tpu.memory_space<semaphore_mem>> -> memref<!tpu.dma_semaphore, #tpu.memory_space<semaphore_mem>>
      tpu.enqueue_dma source(%36 : memref<1x32xf32, #tpu.memory_space<any>>) target(%37 : memref<1x32xf32, #tpu.memory_space<vmem>>) target_semaphore(%39 : memref<!tpu.dma_semaphore, #tpu.memory_space<semaphore_mem>>)
      %c6 = arith.constant 6 : index
      %40 = memref.load %arg1[%c6] : memref<8xi32, #tpu.memory_space<smem>>
      %c6_i32 = arith.constant 6 : i32
      %c0_i32_28 = arith.constant 0 : i32
      %41 = tpu.memref_slice %arg2[%40, %c0_i32_28] : memref<256x32xf32, #tpu.memory_space<any>> -> memref<1x32xf32, #tpu.memory_space<any>>
      %c6_i32_29 = arith.constant 6 : i32
      %c0_i32_30 = arith.constant 0 : i32
      %42 = tpu.memref_slice %arg16[%c6_i32_29, %c0_i32_30] : memref<8x32xf32, #tpu.memory_space<vmem>> -> memref<1x32xf32, #tpu.memory_space<vmem>>
      %43 = tpu.memref_slice %arg18[%c6_i32] : memref<8x!tpu.dma_semaphore, #tpu.memory_space<semaphore_mem>> -> memref<1x!tpu.dma_semaphore, #tpu.memory_space<semaphore_mem>>
      %44 = tpu.memref_squeeze %43 : memref<1x!tpu.dma_semaphore, #tpu.memory_space<semaphore_mem>> -> memref<!tpu.dma_semaphore, #tpu.memory_space<semaphore_mem>>
      tpu.enqueue_dma source(%41 : memref<1x32xf32, #tpu.memory_space<any>>) target(%42 : memref<1x32xf32, #tpu.memory_space<vmem>>) target_semaphore(%44 : memref<!tpu.dma_semaphore, #tpu.memory_space<semaphore_mem>>)
      %c7 = arith.constant 7 : index
      %45 = memref.load %arg1[%c7] : memref<8xi32, #tpu.memory_space<smem>>
      %c7_i32 = arith.constant 7 : i32
      %c0_i32_31 = arith.constant 0 : i32
      %46 = tpu.memref_slice %arg2[%45, %c0_i32_31] : memref<256x32xf32, #tpu.memory_space<any>> -> memref<1x32xf32, #tpu.memory_space<any>>
      %c7_i32_32 = arith.constant 7 : i32
      %c0_i32_33 = arith.constant 0 : i32
      %47 = tpu.memref_slice %arg16[%c7_i32_32, %c0_i32_33] : memref<8x32xf32, #tpu.memory_space<vmem>> -> memref<1x32xf32, #tpu.memory_space<vmem>>
      %48 = tpu.memref_slice %arg18[%c7_i32] : memref<8x!tpu.dma_semaphore, #tpu.memory_space<semaphore_mem>> -> memref<1x!tpu.dma_semaphore, #tpu.memory_space<semaphore_mem>>
      %49 = tpu.memref_squeeze %48 : memref<1x!tpu.dma_semaphore, #tpu.memory_space<semaphore_mem>> -> memref<!tpu.dma_semaphore, #tpu.memory_space<semaphore_mem>>
      tpu.enqueue_dma source(%46 : memref<1x32xf32, #tpu.memory_space<any>>) target(%47 : memref<1x32xf32, #tpu.memory_space<vmem>>) target_semaphore(%49 : memref<!tpu.dma_semaphore, #tpu.memory_space<semaphore_mem>>)
      %c0_i32_34 = arith.constant 0 : i32
      %c0_i32_35 = arith.constant 0 : i32
      %50 = tpu.memref_slice %arg2[%10, %c0_i32_35] : memref<256x32xf32, #tpu.memory_space<any>> -> memref<1x32xf32, #tpu.memory_space<any>>
      %c0_i32_36 = arith.constant 0 : i32
      %c0_i32_37 = arith.constant 0 : i32
      %51 = tpu.memref_slice %arg16[%c0_i32_36, %c0_i32_37] : memref<8x32xf32, #tpu.memory_space<vmem>> -> memref<1x32xf32, #tpu.memory_space<vmem>>
      %52 = tpu.memref_slice %arg18[%c0_i32_34] : memref<8x!tpu.dma_semaphore, #tpu.memory_space<semaphore_mem>> -> memref<1x!tpu.dma_semaphore, #tpu.memory_space<semaphore_mem>>
      %53 = tpu.memref_squeeze %52 : memref<1x!tpu.dma_semaphore, #tpu.memory_space<semaphore_mem>> -> memref<!tpu.dma_semaphore, #tpu.memory_space<semaphore_mem>>
      tpu.wait_dma2 semaphore(%53 : memref<!tpu.dma_semaphore, #tpu.memory_space<semaphore_mem>>) src(%50 : memref<1x32xf32, #tpu.memory_space<any>>) dst(%51 : memref<1x32xf32, #tpu.memory_space<vmem>>)
      %c1_i32_38 = arith.constant 1 : i32
      %c0_i32_39 = arith.constant 0 : i32
      %54 = tpu.memref_slice %arg2[%15, %c0_i32_39] : memref<256x32xf32, #tpu.memory_space<any>> -> memref<1x32xf32, #tpu.memory_space<any>>
      %c1_i32_40 = arith.constant 1 : i32
      %c0_i32_41 = arith.constant 0 : i32
      %55 = tpu.memref_slice %arg16[%c1_i32_40, %c0_i32_41] : memref<8x32xf32, #tpu.memory_space<vmem>> -> memref<1x32xf32, #tpu.memory_space<vmem>>
      %56 = tpu.memref_slice %arg18[%c1_i32_38] : memref<8x!tpu.dma_semaphore, #tpu.memory_space<semaphore_mem>> -> memref<1x!tpu.dma_semaphore, #tpu.memory_space<semaphore_mem>>
      %57 = tpu.memref_squeeze %56 : memref<1x!tpu.dma_semaphore, #tpu.memory_space<semaphore_mem>> -> memref<!tpu.dma_semaphore, #tpu.memory_space<semaphore_mem>>
      tpu.wait_dma2 semaphore(%57 : memref<!tpu.dma_semaphore, #tpu.memory_space<semaphore_mem>>) src(%54 : memref<1x32xf32, #tpu.memory_space<any>>) dst(%55 : memref<1x32xf32, #tpu.memory_space<vmem>>)
      %c2_i32_42 = arith.constant 2 : i32
      %c0_i32_43 = arith.constant 0 : i32
      %58 = tpu.memref_slice %arg2[%20, %c0_i32_43] : memref<256x32xf32, #tpu.memory_space<any>> -> memref<1x32xf32, #tpu.memory_space<any>>
      %c2_i32_44 = arith.constant 2 : i32
      %c0_i32_45 = arith.constant 0 : i32
      %59 = tpu.memref_slice %arg16[%c2_i32_44, %c0_i32_45] : memref<8x32xf32, #tpu.memory_space<vmem>> -> memref<1x32xf32, #tpu.memory_space<vmem>>
      %60 = tpu.memref_slice %arg18[%c2_i32_42] : memref<8x!tpu.dma_semaphore, #tpu.memory_space<semaphore_mem>> -> memref<1x!tpu.dma_semaphore, #tpu.memory_space<semaphore_mem>>
      %61 = tpu.memref_squeeze %60 : memref<1x!tpu.dma_semaphore, #tpu.memory_space<semaphore_mem>> -> memref<!tpu.dma_semaphore, #tpu.memory_space<semaphore_mem>>
      tpu.wait_dma2 semaphore(%61 : memref<!tpu.dma_semaphore, #tpu.memory_space<semaphore_mem>>) src(%58 : memref<1x32xf32, #tpu.memory_space<any>>) dst(%59 : memref<1x32xf32, #tpu.memory_space<vmem>>)
      %c3_i32_46 = arith.constant 3 : i32
      %c0_i32_47 = arith.constant 0 : i32
      %62 = tpu.memref_slice %arg2[%25, %c0_i32_47] : memref<256x32xf32, #tpu.memory_space<any>> -> memref<1x32xf32, #tpu.memory_space<any>>
      %c3_i32_48 = arith.constant 3 : i32
      %c0_i32_49 = arith.constant 0 : i32
      %63 = tpu.memref_slice %arg16[%c3_i32_48, %c0_i32_49] : memref<8x32xf32, #tpu.memory_space<vmem>> -> memref<1x32xf32, #tpu.memory_space<vmem>>
      %64 = tpu.memref_slice %arg18[%c3_i32_46] : memref<8x!tpu.dma_semaphore, #tpu.memory_space<semaphore_mem>> -> memref<1x!tpu.dma_semaphore, #tpu.memory_space<semaphore_mem>>
      %65 = tpu.memref_squeeze %64 : memref<1x!tpu.dma_semaphore, #tpu.memory_space<semaphore_mem>> -> memref<!tpu.dma_semaphore, #tpu.memory_space<semaphore_mem>>
      tpu.wait_dma2 semaphore(%65 : memref<!tpu.dma_semaphore, #tpu.memory_space<semaphore_mem>>) src(%62 : memref<1x32xf32, #tpu.memory_space<any>>) dst(%63 : memref<1x32xf32, #tpu.memory_space<vmem>>)
      %c4_i32_50 = arith.constant 4 : i32
      %c0_i32_51 = arith.constant 0 : i32
      %66 = tpu.memref_slice %arg2[%30, %c0_i32_51] : memref<256x32xf32, #tpu.memory_space<any>> -> memref<1x32xf32, #tpu.memory_space<any>>
      %c4_i32_52 = arith.constant 4 : i32
      %c0_i32_53 = arith.constant 0 : i32
      %67 = tpu.memref_slice %arg16[%c4_i32_52, %c0_i32_53] : memref<8x32xf32, #tpu.memory_space<vmem>> -> memref<1x32xf32, #tpu.memory_space<vmem>>
      %68 = tpu.memref_slice %arg18[%c4_i32_50] : memref<8x!tpu.dma_semaphore, #tpu.memory_space<semaphore_mem>> -> memref<1x!tpu.dma_semaphore, #tpu.memory_space<semaphore_mem>>
      %69 = tpu.memref_squeeze %68 : memref<1x!tpu.dma_semaphore, #tpu.memory_space<semaphore_mem>> -> memref<!tpu.dma_semaphore, #tpu.memory_space<semaphore_mem>>
      tpu.wait_dma2 semaphore(%69 : memref<!tpu.dma_semaphore, #tpu.memory_space<semaphore_mem>>) src(%66 : memref<1x32xf32, #tpu.memory_space<any>>) dst(%67 : memref<1x32xf32, #tpu.memory_space<vmem>>)
      %c5_i32_54 = arith.constant 5 : i32
      %c0_i32_55 = arith.constant 0 : i32
      %70 = tpu.memref_slice %arg2[%35, %c0_i32_55] : memref<256x32xf32, #tpu.memory_space<any>> -> memref<1x32xf32, #tpu.memory_space<any>>
      %c5_i32_56 = arith.constant 5 : i32
      %c0_i32_57 = arith.constant 0 : i32
      %71 = tpu.memref_slice %arg16[%c5_i32_56, %c0_i32_57] : memref<8x32xf32, #tpu.memory_space<vmem>> -> memref<1x32xf32, #tpu.memory_space<vmem>>
      %72 = tpu.memref_slice %arg18[%c5_i32_54] : memref<8x!tpu.dma_semaphore, #tpu.memory_space<semaphore_mem>> -> memref<1x!tpu.dma_semaphore, #tpu.memory_space<semaphore_mem>>
      %73 = tpu.memref_squeeze %72 : memref<1x!tpu.dma_semaphore, #tpu.memory_space<semaphore_mem>> -> memref<!tpu.dma_semaphore, #tpu.memory_space<semaphore_mem>>
      tpu.wait_dma2 semaphore(%73 : memref<!tpu.dma_semaphore, #tpu.memory_space<semaphore_mem>>) src(%70 : memref<1x32xf32, #tpu.memory_space<any>>) dst(%71 : memref<1x32xf32, #tpu.memory_space<vmem>>)
      %c6_i32_58 = arith.constant 6 : i32
      %c0_i32_59 = arith.constant 0 : i32
      %74 = tpu.memref_slice %arg2[%40, %c0_i32_59] : memref<256x32xf32, #tpu.memory_space<any>> -> memref<1x32xf32, #tpu.memory_space<any>>
      %c6_i32_60 = arith.constant 6 : i32
      %c0_i32_61 = arith.constant 0 : i32
      %75 = tpu.memref_slice %arg16[%c6_i32_60, %c0_i32_61] : memref<8x32xf32, #tpu.memory_space<vmem>> -> memref<1x32xf32, #tpu.memory_space<vmem>>
      %76 = tpu.memref_slice %arg18[%c6_i32_58] : memref<8x!tpu.dma_semaphore, #tpu.memory_space<semaphore_mem>> -> memref<1x!tpu.dma_semaphore, #tpu.memory_space<semaphore_mem>>
      %77 = tpu.memref_squeeze %76 : memref<1x!tpu.dma_semaphore, #tpu.memory_space<semaphore_mem>> -> memref<!tpu.dma_semaphore, #tpu.memory_space<semaphore_mem>>
      tpu.wait_dma2 semaphore(%77 : memref<!tpu.dma_semaphore, #tpu.memory_space<semaphore_mem>>) src(%74 : memref<1x32xf32, #tpu.memory_space<any>>) dst(%75 : memref<1x32xf32, #tpu.memory_space<vmem>>)
      %c7_i32_62 = arith.constant 7 : i32
      %c0_i32_63 = arith.constant 0 : i32
      %78 = tpu.memref_slice %arg2[%45, %c0_i32_63] : memref<256x32xf32, #tpu.memory_space<any>> -> memref<1x32xf32, #tpu.memory_space<any>>
      %c7_i32_64 = arith.constant 7 : i32
      %c0_i32_65 = arith.constant 0 : i32
      %79 = tpu.memref_slice %arg16[%c7_i32_64, %c0_i32_65] : memref<8x32xf32, #tpu.memory_space<vmem>> -> memref<1x32xf32, #tpu.memory_space<vmem>>
      %80 = tpu.memref_slice %arg18[%c7_i32_62] : memref<8x!tpu.dma_semaphore, #tpu.memory_space<semaphore_mem>> -> memref<1x!tpu.dma_semaphore, #tpu.memory_space<semaphore_mem>>
      %81 = tpu.memref_squeeze %80 : memref<1x!tpu.dma_semaphore, #tpu.memory_space<semaphore_mem>> -> memref<!tpu.dma_semaphore, #tpu.memory_space<semaphore_mem>>
      tpu.wait_dma2 semaphore(%81 : memref<!tpu.dma_semaphore, #tpu.memory_space<semaphore_mem>>) src(%78 : memref<1x32xf32, #tpu.memory_space<any>>) dst(%79 : memref<1x32xf32, #tpu.memory_space<vmem>>)
      %c0_66 = arith.constant 0 : index
      %c0_67 = arith.constant 0 : index
      %82 = vector.load %arg16[%c0_66, %c0_67] : memref<8x32xf32, #tpu.memory_space<vmem>>, vector<8x32xf32>
      %c0_68 = arith.constant 0 : index
      %c0_69 = arith.constant 0 : index
      %83 = vector.load %arg3[%c0_68, %c0_69] : memref<8x64xf32, #tpu.memory_space<vmem>>, vector<8x64xf32>
      %c0_70 = arith.constant 0 : index
      %c0_71 = arith.constant 0 : index
      %c0_72 = arith.constant 0 : index
      %84 = vector.load %arg4[%c0_70, %c0_71, %c0_72] : memref<8x16x64xf32, #tpu.memory_space<vmem>>, vector<8x16x64xf32>
      %c0_73 = arith.constant 0 : index
      %c0_74 = arith.constant 0 : index
      %85 = vector.load %arg5[%c0_73, %c0_74] : memref<64x32xf32, #tpu.memory_space<vmem>>, vector<64x32xf32>
      %cst_75 = arith.constant dense<0.000000e+00> : vector<8x32xf32>
      %86 = tpu.matmul %83, %85, %cst_75 {dimension_numbers = #tpu.dot_dimension_numbers<[1], [0], [0], [1], [0, 0, 1, 1], [], []>} : vector<8x64xf32>, vector<64x32xf32>, vector<8x32xf32> -> vector<8x32xf32>
      %87 = vector.shape_cast %84 : vector<8x16x64xf32> to vector<128x64xf32>
      %c0_76 = arith.constant 0 : index
      %c0_77 = arith.constant 0 : index
      %88 = vector.load %arg6[%c0_76, %c0_77] : memref<64x32xf32, #tpu.memory_space<vmem>>, vector<64x32xf32>
      %cst_78 = arith.constant dense<0.000000e+00> : vector<128x32xf32>
      %89 = tpu.matmul %87, %88, %cst_78 {dimension_numbers = #tpu.dot_dimension_numbers<[1], [0], [0], [1], [0, 0, 1, 1], [], []>} : vector<128x64xf32>, vector<64x32xf32>, vector<128x32xf32> -> vector<128x32xf32>
      %90 = vector.shape_cast %89 : vector<128x32xf32> to vector<8x16x32xf32>
      %91 = vector.shape_cast %86 : vector<8x32xf32> to vector<8x1x32xf32>
      %92 = vector.broadcast %91 : vector<8x1x32xf32> to vector<8x16x32xf32>
      %93 = arith.addf %90, %92 : vector<8x16x32xf32>
      %c0_79 = arith.constant 0 : index
      %c0_80 = arith.constant 0 : index
      %94 = vector.load %arg7[%c0_79, %c0_80] : memref<1x32xf32, #tpu.memory_space<vmem>>, vector<1x32xf32>
      %95 = vector.shape_cast %94 : vector<1x32xf32> to vector<1x1x32xf32>
      %96 = vector.broadcast %95 : vector<1x1x32xf32> to vector<8x16x32xf32>
      %97 = arith.addf %93, %96 : vector<8x16x32xf32>
      %98 = math.tanh %97 : vector<8x16x32xf32>
      %cst_81 = arith.constant dense<0.000000e+00> : vector<8x16xf32>
      %99 = vector.multi_reduction <add>, %98, %cst_81 [2] : vector<8x16x32xf32> to vector<8x16xf32>
      %cst_82 = arith.constant dense<0xFF800000> : vector<8xf32>
      %100 = vector.multi_reduction <maximumf>, %99, %cst_82 [1] : vector<8x16xf32> to vector<8xf32>
      %101 = vector.shape_cast %100 : vector<8xf32> to vector<8x1xf32>
      %102 = vector.broadcast %101 : vector<8x1xf32> to vector<8x16xf32>
      %103 = arith.subf %99, %102 : vector<8x16xf32>
      %104 = math.exp %103 : vector<8x16xf32>
      %cst_83 = arith.constant dense<0.000000e+00> : vector<8xf32>
      %105 = vector.multi_reduction <add>, %104, %cst_83 [1] : vector<8x16xf32> to vector<8xf32>
      %106 = vector.shape_cast %105 : vector<8xf32> to vector<8x1xf32>
      %107 = tpu.reciprocal %106 {approx = true} : vector<8x1xf32> -> vector<8x1xf32>
      %108 = vector.broadcast %107 : vector<8x1xf32> to vector<8x16xf32>
      %109 = arith.mulf %104, %108 : vector<8x16xf32>
      %110 = vector.shape_cast %109 : vector<8x16xf32> to vector<8x1x16xf32>
      "tpu.trace_start"() <{level = 10 : i32, message = "bqs,bse->bqe"}> : () -> ()
      %cst_84 = arith.constant dense<0.000000e+00> : vector<8x1x64xf32>
      %111 = tpu.matmul %110, %84, %cst_84 {dimension_numbers = #tpu.dot_dimension_numbers<[2], [1], [1], [2], [0, 0, 0, 1, 1, 2], [0], [0]>} : vector<8x1x16xf32>, vector<8x16x64xf32>, vector<8x1x64xf32> -> vector<8x1x64xf32>
      "tpu.trace_stop"() : () -> ()
      %112 = vector.shape_cast %111 : vector<8x1x64xf32> to vector<8x64xf32>
      %113 = tpu.concatenate %82, %112 in 1 : vector<8x32xf32>, vector<8x64xf32> -> vector<8x96xf32>
      %c0_85 = arith.constant 0 : index
      %c0_86 = arith.constant 0 : index
      %114 = vector.load %arg8[%c0_85, %c0_86] : memref<96x192xf32, #tpu.memory_space<vmem>>, vector<96x192xf32>
      %cst_87 = arith.constant dense<0.000000e+00> : vector<8x192xf32>
      %115 = tpu.matmul %113, %114, %cst_87 {dimension_numbers = #tpu.dot_dimension_numbers<[1], [0], [0], [1], [0, 0, 1, 1], [], []>} : vector<8x96xf32>, vector<96x192xf32>, vector<8x192xf32> -> vector<8x192xf32>
      %c0_88 = arith.constant 0 : index
      %c0_89 = arith.constant 0 : index
      %116 = vector.load %arg9[%c0_88, %c0_89] : memref<1x192xf32, #tpu.memory_space<vmem>>, vector<1x192xf32>
      %117 = vector.broadcast %116 : vector<1x192xf32> to vector<8x192xf32>
      %118 = arith.addf %115, %117 : vector<8x192xf32>
      %c0_90 = arith.constant 0 : index
      %c0_91 = arith.constant 0 : index
      %119 = vector.load %arg10[%c0_90, %c0_91] : memref<64x192xf32, #tpu.memory_space<vmem>>, vector<64x192xf32>
      %cst_92 = arith.constant dense<0.000000e+00> : vector<8x192xf32>
      %120 = tpu.matmul %83, %119, %cst_92 {dimension_numbers = #tpu.dot_dimension_numbers<[1], [0], [0], [1], [0, 0, 1, 1], [], []>} : vector<8x64xf32>, vector<64x192xf32>, vector<8x192xf32> -> vector<8x192xf32>
      %c0_93 = arith.constant 0 : index
      %c0_94 = arith.constant 0 : index
      %121 = vector.load %arg11[%c0_93, %c0_94] : memref<1x192xf32, #tpu.memory_space<vmem>>, vector<1x192xf32>
      %122 = vector.broadcast %121 : vector<1x192xf32> to vector<8x192xf32>
      %123 = arith.addf %120, %122 : vector<8x192xf32>
      %124 = vector.extract_strided_slice %118 {offsets = [0, 0], sizes = [8, 64], strides = [1, 1]} : vector<8x192xf32> to vector<8x64xf32>
      %125 = vector.extract_strided_slice %123 {offsets = [0, 0], sizes = [8, 64], strides = [1, 1]} : vector<8x192xf32> to vector<8x64xf32>
      %126 = arith.addf %124, %125 : vector<8x64xf32>
      %127 = arith.negf %126 : vector<8x64xf32>
      %128 = math.exp %127 : vector<8x64xf32>
      %cst_95 = arith.constant 1.000000e+00 : f32
      %129 = vector.broadcast %cst_95 : f32 to vector<8x64xf32>
      %130 = arith.addf %129, %128 : vector<8x64xf32>
      %131 = arith.divf %129, %130 : vector<8x64xf32>
      %132 = vector.extract_strided_slice %118 {offsets = [0, 64], sizes = [8, 64], strides = [1, 1]} : vector<8x192xf32> to vector<8x64xf32>
      %133 = vector.extract_strided_slice %123 {offsets = [0, 64], sizes = [8, 64], strides = [1, 1]} : vector<8x192xf32> to vector<8x64xf32>
      %134 = arith.addf %132, %133 : vector<8x64xf32>
      %135 = arith.negf %134 : vector<8x64xf32>
      %136 = math.exp %135 : vector<8x64xf32>
      %cst_96 = arith.constant 1.000000e+00 : f32
      %137 = vector.broadcast %cst_96 : f32 to vector<8x64xf32>
      %138 = arith.addf %137, %136 : vector<8x64xf32>
      %139 = arith.divf %137, %138 : vector<8x64xf32>
      %140 = vector.extract_strided_slice %118 {offsets = [0, 128], sizes = [8, 64], strides = [1, 1]} : vector<8x192xf32> to vector<8x64xf32>
      %141 = vector.extract_strided_slice %123 {offsets = [0, 128], sizes = [8, 64], strides = [1, 1]} : vector<8x192xf32> to vector<8x64xf32>
      %142 = arith.mulf %131, %141 : vector<8x64xf32>
      %143 = arith.addf %140, %142 : vector<8x64xf32>
      %144 = math.tanh %143 : vector<8x64xf32>
      %cst_97 = arith.constant 1.000000e+00 : f32
      %145 = vector.broadcast %cst_97 : f32 to vector<8x64xf32>
      %146 = arith.subf %145, %139 : vector<8x64xf32>
      %147 = arith.mulf %146, %144 : vector<8x64xf32>
      %148 = arith.mulf %139, %83 : vector<8x64xf32>
      %149 = arith.addf %147, %148 : vector<8x64xf32>
      %c0_98 = arith.constant 0 : index
      %c0_99 = arith.constant 0 : index
      %150 = vector.load %arg15[%c0_98, %c0_99] : memref<8x64xf32, #tpu.memory_space<vmem>>, vector<8x64xf32>
      tpu.vector_store %arg15[%c0_98, %c0_99], %149 {strides = array<i32>} : memref<8x64xf32, #tpu.memory_space<vmem>>, vector<8x64xf32>,
      %151 = tpu.concatenate %149, %112, %82 in 1 : vector<8x64xf32>, vector<8x64xf32>, vector<8x32xf32> -> vector<8x160xf32>
      %c0_100 = arith.constant 0 : index
      %c0_101 = arith.constant 0 : index
      %152 = vector.load %arg17[%c0_100, %c0_101] : memref<8x160xf32, #tpu.memory_space<vmem>>, vector<8x160xf32>
      tpu.vector_store %arg17[%c0_100, %c0_101], %151 {strides = array<i32>} : memref<8x160xf32, #tpu.memory_space<vmem>>, vector<8x160xf32>,
    } else {
    }
    %c0 = arith.constant 0 : index
    %c0_1 = arith.constant 0 : index
    %3 = vector.load %arg17[%c0, %c0_1] : memref<8x160xf32, #tpu.memory_space<vmem>>, vector<8x160xf32>
    %c0_2 = arith.constant 0 : index
    %c0_3 = arith.constant 0 : index
    %4 = vector.load %arg12[%c0_2, %c0_3] : memref<160x128xf32, #tpu.memory_space<vmem>>, vector<160x128xf32>
    %cst = arith.constant dense<0.000000e+00> : vector<8x128xf32>
    %5 = tpu.matmul %3, %4, %cst {dimension_numbers = #tpu.dot_dimension_numbers<[1], [0], [0], [1], [0, 0, 1, 1], [], []>} : vector<8x160xf32>, vector<160x128xf32>, vector<8x128xf32> -> vector<8x128xf32>
    %c0_4 = arith.constant 0 : index
    %c0_5 = arith.constant 0 : index
    %6 = vector.load %arg13[%c0_4, %c0_5] : memref<1x128xf32, #tpu.memory_space<vmem>>, vector<1x128xf32>
    %7 = vector.broadcast %6 : vector<1x128xf32> to vector<8x128xf32>
    %8 = arith.addf %5, %7 : vector<8x128xf32>
    %c0_6 = arith.constant 0 : index
    %c0_7 = arith.constant 0 : index
    %9 = vector.load %arg14[%c0_6, %c0_7] : memref<8x128xf32, #tpu.memory_space<vmem>>, vector<8x128xf32>
    tpu.vector_store %arg14[%c0_6, %c0_7], %8 {strides = array<i32>} : memref<8x128xf32, #tpu.memory_space<vmem>>, vector<8x128xf32>,
    return
  }
  func.func @transform_1(%arg0: i32, %arg1: memref<8xi32, #tpu.memory_space<smem>>) -> (i32, i32) {
    %c0_i32 = arith.constant 0 : i32
    %c0_i32_0 = arith.constant 0 : i32
    %c0_i32_1 = arith.constant 0 : i32
    return %c0_i32, %c0_i32_0 : i32, i32
  }
  func.func @transform_2(%arg0: i32, %arg1: memref<8xi32, #tpu.memory_space<smem>>) -> (i32, i32, i32) {
    %c0_i32 = arith.constant 0 : i32
    %c0_i32_0 = arith.constant 0 : i32
    %c0_i32_1 = arith.constant 0 : i32
    %c0_i32_2 = arith.constant 0 : i32
    return %c0_i32, %c0_i32_0, %c0_i32_1 : i32, i32, i32
  }
  func.func @transform_3(%arg0: i32, %arg1: memref<8xi32, #tpu.memory_space<smem>>) -> (i32, i32) {
    %c0_i32 = arith.constant 0 : i32
    %c0_i32_0 = arith.constant 0 : i32
    %c0_i32_1 = arith.constant 0 : i32
    return %c0_i32, %c0_i32_0 : i32, i32
  }
  func.func @transform_4(%arg0: i32, %arg1: memref<8xi32, #tpu.memory_space<smem>>) -> (i32, i32) {
    %c0_i32 = arith.constant 0 : i32
    %c0_i32_0 = arith.constant 0 : i32
    %c0_i32_1 = arith.constant 0 : i32
    return %c0_i32, %c0_i32_0 : i32, i32
  }
  func.func @transform_5(%arg0: i32, %arg1: memref<8xi32, #tpu.memory_space<smem>>) -> (i32, i32) {
    %c0_i32 = arith.constant 0 : i32
    %c0_i32_0 = arith.constant 0 : i32
    %c0_i32_1 = arith.constant 0 : i32
    return %c0_i32, %c0_i32_0 : i32, i32
  }
  func.func @transform_6(%arg0: i32, %arg1: memref<8xi32, #tpu.memory_space<smem>>) -> (i32, i32) {
    %c0_i32 = arith.constant 0 : i32
    %c0_i32_0 = arith.constant 0 : i32
    %c0_i32_1 = arith.constant 0 : i32
    return %c0_i32, %c0_i32_0 : i32, i32
  }
  func.func @transform_7(%arg0: i32, %arg1: memref<8xi32, #tpu.memory_space<smem>>) -> (i32, i32) {
    %c0_i32 = arith.constant 0 : i32
    %c0_i32_0 = arith.constant 0 : i32
    %c0_i32_1 = arith.constant 0 : i32
    return %c0_i32, %c0_i32_0 : i32, i32
  }
  func.func @transform_8(%arg0: i32, %arg1: memref<8xi32, #tpu.memory_space<smem>>) -> (i32, i32) {
    %c0_i32 = arith.constant 0 : i32
    %c0_i32_0 = arith.constant 0 : i32
    %c0_i32_1 = arith.constant 0 : i32
    return %c0_i32, %c0_i32_0 : i32, i32
  }
  func.func @transform_9(%arg0: i32, %arg1: memref<8xi32, #tpu.memory_space<smem>>) -> (i32, i32) {
    %c0_i32 = arith.constant 0 : i32
    %c0_i32_0 = arith.constant 0 : i32
    %c0_i32_1 = arith.constant 0 : i32
    return %c0_i32, %c0_i32_0 : i32, i32
  }
  func.func @transform_10(%arg0: i32, %arg1: memref<8xi32, #tpu.memory_space<smem>>) -> (i32, i32) {
    %c0_i32 = arith.constant 0 : i32
    %c0_i32_0 = arith.constant 0 : i32
    return %c0_i32, %arg0 : i32, i32
  }
  func.func @transform_11(%arg0: i32, %arg1: memref<8xi32, #tpu.memory_space<smem>>) -> (i32, i32) {
    %c0_i32 = arith.constant 0 : i32
    %c0_i32_0 = arith.constant 0 : i32
    return %c0_i32, %arg0 : i32, i32
  }
  func.func @transform_12(%arg0: i32, %arg1: memref<8xi32, #tpu.memory_space<smem>>) -> (i32, i32) {
    %c0_i32 = arith.constant 0 : i32
    %c0_i32_0 = arith.constant 0 : i32
    return %c0_i32, %arg0 : i32, i32
  }
  func.func @transform_13(%arg0: i32, %arg1: memref<8xi32, #tpu.memory_space<smem>>) -> (i32, i32) {
    %c0_i32 = arith.constant 0 : i32
    %c0_i32_0 = arith.constant 0 : i32
    %c0_i32_1 = arith.constant 0 : i32
    return %c0_i32, %c0_i32_0 : i32, i32
  }
}

</mosaic_0001>

<bundles_post_ra>
// kernel: decoder_forward.1
= control target key start
LH: loop header
LB: loop body
LE: loop exit
PB: predicated region body
PF: predicated region fallthrough
CT: control target
= control target key end

     0   :  { %s5479_s0 = inlined_call_operand.hbm [shape: s32[8], index: 0, kind: input, shape index: {}]   ;;  %s5480_s1 = inlined_call_operand.hbm [shape: f32[256,32], index: 1, kind: input, shape index: {}]   ;;  %s5481_s2 = inlined_call_operand.hbm [shape: f32[8,64], index: 2, kind: input, shape index: {}]   ;;  %s5482_s3 = inlined_call_operand.hbm [shape: f32[8,16,64], index: 3, kind: input, shape index: {}]   ;;  %s5483_s4 = inlined_call_operand.hbm [shape: f32[64,32], index: 4, kind: input, shape index: {}]   ;;  %s5484_s5 = inlined_call_operand.hbm [shape: f32[64,32], index: 5, kind: input, shape index: {}]   ;;  %s5485_s6 = inlined_call_operand.hbm [shape: f32[1,32], index: 6, kind: input, shape index: {}]   ;;  %s5486_s7 = inlined_call_operand.hbm [shape: f32[96,192], index: 7, kind: input, shape index: {}]   ;;  %s5487_s8 = inlined_call_operand.hbm [shape: f32[1,192], index: 8, kind: input, shape index: {}]   ;;  %s5488_s9 = inlined_call_operand.hbm [shape: f32[64,192], index: 9, kind: input, shape index: {}]   ;;  %s5489_s10 = inlined_call_operand.hbm [shape: f32[1,192], index: 10, kind: input, shape index: {}]   ;;  %s5490_s11 = inlined_call_operand.hbm [shape: f32[160,256], index: 11, kind: input, shape index: {}]   ;;  %s5491_s12 = inlined_call_operand.hbm [shape: f32[1,256], index: 12, kind: input, shape index: {}]   ;;  %s5492_s13 = inlined_call_operand.hbm [shape: f32[8,256], index: 13, kind: output, shape index: {0}]   ;;  %s5493_s14 = inlined_call_operand.hbm [shape: f32[8,64], index: 14, kind: output, shape index: {1}]  }
   0x1   :  { %5524 = sst [smem:[#allocation67_spill]] %s5480_s1  ;;  %s3630_s15 = scalar_lea.hbm %s5479_s0, 16 }
   0x2   :  { %5525 = sst [smem:[#allocation68_spill]] %s5481_s2  ;;  %p3631_p0 = scmp.ne.s32.totalorder %s5479_s0, %s3630_s15 }
   0x3   :  { %5526 = sst [smem:[#allocation69_spill]] %s5482_s3  ;;  %p3634_p1 = scmp.lt.u32.totalorder %s3630_s15, %s5479_s0 }
   0x4   :  { %5527 = sst [smem:[#allocation70_spill]] %s5483_s4 }
   0x5   :  { %5528 = sst [smem:[#allocation71_spill]] %s5484_s5  ;;  %p3636_p2 = pnand %p3634_p1, %p3631_p0 }
   0x6   :  { %5529 = sst [smem:[#allocation72_spill]] %s5485_s6 }
   0x7   :  { %5530 = sst [smem:[#allocation73_spill]] %s5486_s7 }
   0x8   :  { %5531 = sst [smem:[#allocation74_spill]] %s5488_s9 }
   0x9   :  { %5532 = sst [smem:[#allocation75_spill]] %s5490_s11 }
   0xa   :  { %5533 = sst [smem:[#allocation76_spill]] %s5491_s12 }
   0xb   :  { %5534 = sst [smem:[#allocation77_spill]] %s5492_s13 }
   0xc   :  { %5535 = sst [smem:[#allocation78_spill]] %s5493_s14 }
   0xd   :  { %3639 = shalt.err (!%p3636_p2)  }
   0xe   :  { %s4280_s20 = smov [#allocation6]  }
   0xf   :  { %21 = dma.hbm_to_smem %s5479_s0, 16, %s4280_s20, [#allocation5] }
  0x10   :  { %4214 = dma.done.wait [#allocation5], 16 }
  0x11   :  { %4215 = vsyncadd [#allocation5], 4294967280 }
  0x12   :  { %23 = sfence }
  0x13   :  { %24 = vsyncpa [#allocation8], 0 }
  0x14   :  { %25 = vsyncpa [#allocation11], 0 }
  0x15   :  { %26 = vsyncpa [#allocation14], 0 }
  0x16   :  { %27 = vsyncpa [#allocation17], 0 }
  0x17   :  { %28 = vsyncpa [#allocation20], 0 }
  0x18   :  { %29 = vsyncpa [#allocation23], 0 }
  0x19   :  { %31 = vsyncpa [#allocation23 + $0x1], 0 }
  0x1a   :  { %32 = vsyncpa [#allocation9], 0 }
  0x1b   :  { %34 = vsyncpa [#allocation9 + $0x1], 0 }
  0x1c   :  { %35 = vsyncpa [#allocation27], 0  ;;  %s4401_s23 = smov 0   ;;  %s4403_s24 = smov 0  }
  0x1d   :  { %s4405_s25 = smov 0   ;;  %s4407_s0 = smov 0  }
  0x1e LB: > { %s4281_s26 = smov [#allocation10]   ;;  %s4422_s28 = sadd.s32 4294967295, %s4278_s0   ;;  %s4278_s0 = sphi %s4407_s0, %s5602_s0   ;;  %s4274_s25 = sphi %s4405_s25, %s5606_s25   ;;  %s4270_s24 = sphi %s4403_s24, %s5605_s24   ;;  %s4266_s23 = sphi %s4401_s23, %s5604_s23  }
  0x1f   : > { %s357_s27 = sshll.u32 %s4281_s26, 4  ;;  %p3004_p3 = scmp.ge.s32.totalorder %s4278_s0, 1  ;;  %s4428_s27 = int_to_ptr.vmem [resolvable:$true] %s357_s27 }
  0x20   : > { %p5503_p4 = scmp.eq.s32.totalorder %s4422_s28, 0  ;;  %p334_p5 = scmp.lt.s32.totalorder %s4278_s0, 3 }
  0x21   : > { %s4282_s30 = smov [#allocation13]   ;;  %s4283_s17 = smov [#allocation16]  }
  0x22   : > { %p4430_p7 = pnand %p3004_p3, %p334_p5  ;;  %s383_s15 = sshll.u32 %s4282_s30, 4  ;;  %s4443_s15 = int_to_ptr.vmem [resolvable:$true] %s383_s15 }
  0x23   : > { %s407_s18 = sshll.u32 %s4283_s17, 4  ;;  %s5539_s3 = sld [smem:[#allocation69_spill]]  ;;  %s4445_s18 = int_to_ptr.vmem [resolvable:$true] %s407_s18 }
  0x24   : > { %s5536_s29 = scalar_select %p4430_p7, 1, 0 }
  0x25   : > { %p3431_p9 = pneg %p4430_p7 }
  0x26   : > { %5537 = sst [smem:[#allocation63_spill]] %s5536_s29 }
  0x27   : > { %p4439_p10 = pnand %p3431_p9, %p5503_p4 }
  0x29   : > { %s5538_s16 = scalar_select %p4439_p10, 1, 0 }
  0x2a   : > { %s3640_s21 = scalar_lea.hbm %s5539_s3, 2048  ;;  %p4455_p12 = pneg %p4439_p10 }
  0x2b   : > { %p3641_p11 = scmp.ne.s32.totalorder %s5539_s3, %s3640_s21  ;;  %p3647_p1 = scmp.lt.u32.totalorder %s3640_s21, %s5539_s3 }
  0x2d   : > { %p3643_p13 = pnand %p4455_p12, %p3641_p11 }
  0x2f   : > { %p3644_p0 = pneg %p3643_p13 }
  0x31   : > { %p3649_p2 = pnand %p3647_p1, %p3644_p0 }
  0x33   : > { %3652 = shalt.err (!%p3649_p2)
}
  0x34   : > { %s3653_s19 = scalar_lea.vmem %s4428_s27, 2048  ;;  %p3661_p8 = scmp.lt.s32.totalorder %s4428_s27, %s4428_s27 }
  0x35   : > { %p3654_p3 = scmp.ne.s32.totalorder %s4428_s27, %s3653_s19  ;;  %p3662_p6 = scmp.lt.s32.totalorder %s3653_s19, %s3653_s19 }
  0x37   : > { %p3656_p5 = pnand %p3654_p3, %p4455_p12  ;;  %p3663_p11 = por %p3662_p6, %p3661_p8 }
  0x39   : > { %p3657_p9 = pneg %p3656_p5 }
  0x3b   : > { %p3664_p13 = pnand %p3663_p11, %p3657_p9 }
  0x3d   : > { %3667 = shalt.err (!%p3664_p13)
}
  0x3e   : > { %s5499_s20 = smov 128   ;;  %s5501_s13 = smov 8  }
  0x3f   : > { %3437 = dma.hbm_to_vmem [thread:$0]  (!%p4439_p10), %s5539_s3, 2048, %s4428_s27, [#allocation11], %s5499_s20, %s5499_s20, %s5501_s13  }
  0x40   : > { %s5541_s5 = sld [smem:[#allocation71_spill]] }
  0x46   : > { %s3668_s19 = scalar_lea.hbm %s5541_s5, 1024 }
  0x47   : > { %p3669_p6 = scmp.ne.s32.totalorder %s5541_s5, %s3668_s19  ;;  %p3675_p1 = scmp.lt.u32.totalorder %s3668_s19, %s5541_s5 }
  0x49   : > { %p3671_p8 = pnand %p3669_p6, %p4455_p12 }
  0x4b   : > { %p3672_p0 = pneg %p3671_p8 }
  0x4d   : > { %p3677_p2 = pnand %p3675_p1, %p3672_p0 }
  0x4f   : > { %3680 = shalt.err (!%p3677_p2)
}
  0x50   : > { %s3681_s27 = scalar_lea.vmem %s4443_s15, 1024  ;;  %p3689_p11 = scmp.lt.s32.totalorder %s4443_s15, %s4443_s15 }
  0x51   : > { %p3682_p3 = scmp.ne.s32.totalorder %s4443_s15, %s3681_s27  ;;  %p3690_p13 = scmp.lt.s32.totalorder %s3681_s27, %s3681_s27 }
  0x53   : > { %p3684_p5 = pnand %p3682_p3, %p4455_p12  ;;  %p3691_p6 = por %p3690_p13, %p3689_p11 }
  0x55   : > { %p3685_p9 = pneg %p3684_p5 }
  0x57   : > { %p3692_p8 = pnand %p3691_p6, %p3685_p9 }
  0x59   : > { %3695 = shalt.err (!%p3692_p8)
}
  0x5a   : > { %3443 = dma.hbm_to_vmem [thread:$0]  (!%p4439_p10), %s5541_s5, 1024, %s4443_s15, [#allocation14], %s5499_s20, %s5499_s20, %s5501_s13  }
  0x5b   : > { %s5542_s7 = sld [smem:[#allocation73_spill]] }
  0x61   : > { %s3696_s21 = scalar_lea.hbm %s5542_s7, 3072 }
  0x62   : > { %p3697_p0 = scmp.ne.s32.totalorder %s5542_s7, %s3696_s21  ;;  %p3703_p3 = scmp.lt.u32.totalorder %s3696_s21, %s5542_s7 }
  0x64   : > { %p3699_p1 = pnand %p3697_p0, %p4455_p12 }
  0x66   : > { %p3700_p2 = pneg %p3699_p1 }
  0x68   : > { %p3705_p5 = pnand %p3703_p3, %p3700_p2 }
  0x6a   : > { %3708 = shalt.err (!%p3705_p5)
}
  0x6b   : > { %s3709_s15 = scalar_lea.vmem %s4445_s18, 3072  ;;  %p3717_p6 = scmp.lt.s32.totalorder %s4445_s18, %s4445_s18 }
  0x6c   : > { %p3710_p9 = scmp.ne.s32.totalorder %s4445_s18, %s3709_s15  ;;  %p3718_p8 = scmp.lt.s32.totalorder %s3709_s15, %s3709_s15 }
  0x6e   : > { %p3712_p11 = pnand %p3710_p9, %p4455_p12  ;;  %p3719_p0 = por %p3718_p8, %p3717_p6 }
  0x70   : > { %p3713_p13 = pneg %p3712_p11 }
  0x72   : > { %p3720_p1 = pnand %p3719_p0, %p3713_p13 }
  0x74   : > { %3723 = shalt.err (!%p3720_p1)
}
  0x75   : > { %s5505_s27 = smov 256   ;;  %s4287_s1 = smov 16  }
  0x76   : > { %3449 = dma.hbm_to_vmem [thread:$0]  (!%p4439_p10), %s5542_s7, 3072, %s4445_s18, [#allocation17], %s5505_s27, %s5505_s27, %s4287_s1  }
  0x77   : > { %s4288_s29 = smov [#allocation19]   ;;  %s5543_s9 = sld [smem:[#allocation74_spill]] }
  0x78   : > { %s431_s21 = sshll.u32 %s4288_s29, 4  ;;  %s432_s21 = int_to_ptr.vmem [resolvable:$true] %s431_s21 }
  0x7d   : > { %s3724_s17 = scalar_lea.hbm %s5543_s9, 2048 }
  0x7e   : > { %p3725_p2 = scmp.ne.s32.totalorder %s5543_s9, %s3724_s17  ;;  %p3731_p9 = scmp.lt.u32.totalorder %s3724_s17, %s5543_s9 }
  0x80   : > { %p3727_p3 = pnand %p3725_p2, %p4455_p12 }
  0x82   : > { %p3728_p5 = pneg %p3727_p3 }
  0x84   : > { %p3733_p11 = pnand %p3731_p9, %p3728_p5 }
  0x86   : > { %3736 = shalt.err (!%p3733_p11)
}
  0x87   : > { %s3737_s18 = scalar_lea.vmem %s432_s21, 2048  ;;  %p3745_p0 = scmp.lt.s32.totalorder %s432_s21, %s432_s21 }
  0x88   : > { %p3738_p13 = scmp.ne.s32.totalorder %s432_s21, %s3737_s18  ;;  %p3746_p1 = scmp.lt.s32.totalorder %s3737_s18, %s3737_s18 }
  0x8a   : > { %p3740_p6 = pnand %p3738_p13, %p4455_p12  ;;  %p3747_p4 = por %p3746_p1, %p3745_p0 }
  0x8c   : > { %p3741_p8 = pneg %p3740_p6 }
  0x8e   : > { %p3748_p7 = pnand %p3747_p4, %p3741_p8 }
  0x90   : > { %3751 = shalt.err (!%p3748_p7)
}
  0x91   : > { %3455 = dma.hbm_to_vmem [thread:$0]  (!%p4439_p10), %s5543_s9, 2048, %s432_s21, [#allocation20], %s5505_s27, %s5505_s27, %s4287_s1  }
  0x92   : > { %s3003_s13 = sadd.s32 4294967294, %s4278_s0   ;;  %s4552_s14 = sadd.s32 1, %s4278_s0  }
  0x93   : > { %5544 = sst [smem:[#allocation64_spill]] %s4552_s14  ;;  %s234_s29 = ssub.s32 %s4278_s0, %s4552_s14 }
  0x94   : > { %s237_s22 = sadd.s32 1, %s4274_s25  ;;  %p235_p4 = scmp.eq.s32.totalorder %s234_s29, 0 }
  0x95   : > { %p244_p7 = scmp.ne.s32.totalorder %s4274_s25, %s4270_s24  ;;  %p245_p2 = scmp.eq.s32.totalorder %s4278_s0, 0 }
  0x96   : > { %p250_p3 = scmp.ne.s32.totalorder %s4270_s24, %s4266_s23  ;;  %p5546_p9 = scmp.eq.s32.totalorder %s4422_s28, 0 }
  0x97   : > { %s4563_s26 = scalar_select %p235_p4, %s4274_s25, %s237_s22  }
  0x98   : > { %p246_p5 = por %p245_p2, %p244_p7  ;;  %p4567_p11 = por %p5546_p9, %p250_p3 }
  0x99   : > { %5545 = sst [smem:[#allocation65_spill]] %s4563_s26  ;;  %p5507_p13 = scmp.eq.s32.totalorder %s4422_s28, 1 }
  0x9a   : > { %s5547_s1 = scalar_select %p4567_p11, 1, 0 }
  0x9b   : > { %p306_p6 = scmp.eq.s32.totalorder %s3003_s13, 1  ;;  %p3479_p8 = scmp.lt.s32.totalorder %s4278_s0, 2 }
  0x9c   : > { %s456_s21 = sand.u32 1, %s4278_s0   ;;  %p4576_p0 = por %p5507_p13, %p244_p7 }
  0x9d   : > { %p4580_p1 = por %p306_p6, %p250_p3  ;;  %s5506_s15 = sand.u32 1, %s4274_s25  }
  0x9e   : > { %s5548_s17 = scalar_select %p4576_p0, 1, 0 }
  0x9f   : > { %s5549_s19 = scalar_select %p4580_p1, 1, 0 }
  0xa0   : > { %s3383_s18 = smul.u32 160, %s5506_s15  ;;  %s3015_s12 = sshll.u32 %s4278_s0, 7 }
  0xa1   : > { %5550 = sst [smem:[#allocation66_spill]] %s5549_s19  ;;  %s5551_s11 = sld [smem:[#allocation75_spill]] }
  0xa2   : > { %p4593_p4 = pnand %p3479_p8, %p246_p5  ;;  %s460_s27 = scalar_lea.vmem [#allocation22], %s3383_s18 }
  0xa3   : > { %s466_s3 = sshll.u32 %s460_s27, 4  ;;  %s4289_s15 = smov [#allocation7]   ;;  %s4597_s3 = int_to_ptr.vmem [resolvable:$true] %s466_s3 }
  0xa4   : > { %s5552_s13 = scalar_select %p4593_p4, 1, 0 }
  0xa5   : > { %s4599_s5 = sshll.u32 %s4289_s15, 4  ;;  %s4601_s20 = scalar_lea.sflag [#allocation23], %s456_s21  ;;  %s348_s5 = int_to_ptr.vmem [resolvable:$true] %s4599_s5 }
  0xa6   : > { %p5514_p2 = pneg %p4593_p4 }
  0xa7   : > { %s4591_s22 = scalar_lea.hbm %s5551_s11, %s3015_s12  ;;  %s3757_s18 = scalar_lea.hbm %s5551_s11, 5120 }
  0xa8   : > { %s3752_s12 = scalar_lea.hbm %s4591_s22, 2560  ;;  %p3758_p9 = scmp.lt.u32.totalorder %s4591_s22, %s5551_s11 }
  0xa9   : > { %p3753_p7 = scmp.ne.s32.totalorder %s4591_s22, %s3752_s12  ;;  %p3759_p6 = scmp.lt.u32.totalorder %s3757_s18, %s3752_s12 }
  0xaa   : > { %p3761_p13 = scmp.lt.u32.totalorder %s3752_s12, %s4591_s22 }
  0xab   : > { %p3755_p3 = pnand %p5514_p2, %p3753_p7  ;;  %p3760_p8 = por %p3759_p6, %p3758_p9 }
  0xad   : > { %p3756_p5 = pneg %p3755_p3  ;;  %p3762_p1 = por %p3761_p13, %p3760_p8 }
  0xaf   : > { %p3763_p0 = pnand %p3762_p1, %p3756_p5 }
  0xb1   : > { %3766 = shalt.err (!%p3763_p0)
}
  0xb2   : > { %s3767_s21 = scalar_lea.vmem %s4597_s3, 2560  ;;  %s4290_s7 = smov [#allocation22]  }
  0xb3   : > { %p3768_p7 = scmp.ne.s32.totalorder %s4597_s3, %s3767_s21  ;;  %s3772_s15 = sshll.u32 %s4290_s7, 4  ;;  %s3773_s15 = int_to_ptr.vmem [resolvable:$false] %s3772_s15 }
  0xb4   : > { %s3774_s9 = scalar_lea.vmem %s3773_s15, 5120  ;;  %p3775_p10 = scmp.lt.s32.totalorder %s4597_s3, %s3773_s15 }
  0xb5   : > { %p3770_p3 = pnand %p3768_p7, %p5514_p2  ;;  %p3776_p9 = scmp.lt.s32.totalorder %s3774_s9, %s3767_s21 }
  0xb7   : > { %p3771_p11 = pneg %p3770_p3  ;;  %p3777_p6 = por %p3776_p9, %p3775_p10 }
  0xb9   : > { %p3778_p13 = pnand %p3777_p6, %p3771_p11 }
  0xbb   : > { %3781 = shalt.err (!%p3778_p13)
}
  0xbc   : > { %s5553_s12 = smov 8   ;;  %s5554_s29 = smov 128  }
  0xbd   : > { %s5555_s18 = smov 256   ;;  %s5556_s2 = sld [smem:[#allocation68_spill]] }
  0xbe   : > { %3462 = dma.hbm_to_vmem [thread:$0]  (!%p4593_p4), %s4591_s22, 2560, %s4597_s3, %s4601_s20, %s5555_s18, %s5554_s29, %s5553_s12  }
  0xc3   : > { %s3782_s15 = scalar_lea.hbm %s5556_s2, 128 }
  0xc4   : > { %p3783_p10 = scmp.ne.s32.totalorder %s5556_s2, %s3782_s15  ;;  %p3789_p1 = scmp.lt.u32.totalorder %s3782_s15, %s5556_s2 }
  0xc6   : > { %p3785_p11 = pnand %p3783_p10, %p4455_p12 }
  0xc8   : > { %p3786_p0 = pneg %p3785_p11 }
  0xca   : > { %p3791_p5 = pnand %p3789_p1, %p3786_p0 }
  0xcc   : > { %3794 = shalt.err (!%p3791_p5)
}
  0xcd   : > { %s3795_s14 = scalar_lea.vmem %s348_s5, 128  ;;  %p3803_p9 = scmp.lt.s32.totalorder %s348_s5, %s348_s5 }
  0xce   : > { %p3796_p8 = scmp.ne.s32.totalorder %s348_s5, %s3795_s14  ;;  %p3804_p6 = scmp.lt.s32.totalorder %s3795_s14, %s3795_s14 }
  0xd0   : > { %p3798_p7 = pnand %p3796_p8, %p4455_p12  ;;  %p3805_p13 = por %p3804_p6, %p3803_p9 }
  0xd2   : > { %p3799_p3 = pneg %p3798_p7 }
  0xd4   : > { %p3806_p2 = pnand %p3805_p13, %p3799_p3 }
  0xd6   : > { %3809 = shalt.err (!%p3806_p2)
}
  0xd7   : > { %p5557_p10 = scmp.ne.s32.totalorder %s5538_s16, 0  ;;  %s4291_s11 = smov [#allocation12]  }
  0xd8   : > { %s370_s26 = sshll.u32 %s4291_s11, 4  ;;  %s4292_s18 = smov [#allocation15]   ;;  %s371_s26 = int_to_ptr.vmem [resolvable:$true] %s370_s26 }
  0xd9   : > { %3434 = dma.hbm_to_vmem [thread:$0]  (!%p5557_p10), %s5556_s2, 128, %s348_s5, [#allocation8]  }
  0xda   : > { %s397_s27 = sshll.u32 %s4292_s18, 4  ;;  %s5558_s4 = sld [smem:[#allocation70_spill]]  ;;  %s398_s27 = int_to_ptr.vmem [resolvable:$true] %s397_s27 }
  0xe0   : > { %s3810_s21 = scalar_lea.hbm %s5558_s4, 1024 }
  0xe1   : > { %p3811_p2 = scmp.ne.s32.totalorder %s5558_s4, %s3810_s21  ;;  %p3817_p1 = scmp.lt.u32.totalorder %s3810_s21, %s5558_s4 }
  0xe3   : > { %p3813_p11 = pnand %p3811_p2, %p4455_p12 }
  0xe5   : > { %p3814_p0 = pneg %p3813_p11 }
  0xe7   : > { %p3819_p5 = pnand %p3817_p1, %p3814_p0 }
  0xe9   : > { %3822 = shalt.err (!%p3819_p5)
}
  0xea   : > { %s3823_s5 = scalar_lea.vmem %s371_s26, 1024  ;;  %p3831_p9 = scmp.lt.s32.totalorder %s371_s26, %s371_s26 }
  0xeb   : > { %p3824_p8 = scmp.ne.s32.totalorder %s371_s26, %s3823_s5  ;;  %p3832_p6 = scmp.lt.s32.totalorder %s3823_s5, %s3823_s5 }
  0xed   : > { %p3826_p7 = pnand %p3824_p8, %p4455_p12  ;;  %p3833_p13 = por %p3832_p6, %p3831_p9 }
  0xef   : > { %p3827_p3 = pneg %p3826_p7 }
  0xf1   : > { %p3834_p4 = pnand %p3833_p13, %p3827_p3 }
  0xf3   : > { %3837 = shalt.err (!%p3834_p4)
}
  0xf4   : > { %3440 = dma.hbm_to_vmem [thread:$0]  (!%p5557_p10), %s5558_s4, 1024, %s371_s26, [#allocation11], %s5554_s29, %s5554_s29, %s5553_s12  }
  0xf5   : > { %s5559_s6 = sld [smem:[#allocation72_spill]] }
  0xfb   : > { %s3838_s7 = scalar_lea.hbm %s5559_s6, 16 }
  0xfc   : > { %p3839_p2 = scmp.ne.s32.totalorder %s5559_s6, %s3838_s7  ;;  %p3845_p0 = scmp.lt.u32.totalorder %s3838_s7, %s5559_s6 }
  0xfe   : > { %p3841_p4 = pnand %p3839_p2, %p4455_p12 }
 0x100   : > { %p3842_p11 = pneg %p3841_p4 }
 0x102   : > { %p3847_p1 = pnand %p3845_p0, %p3842_p11 }
 0x104   : > { %3850 = shalt.err (!%p3847_p1)
}
 0x105   : > { %s3851_s3 = scalar_lea.vmem %s398_s27, 16  ;;  %s3858_s12 = scalar_lea.vmem %s398_s27, 32 }
 0x106   : > { %p3852_p5 = scmp.ne.s32.totalorder %s398_s27, %s3851_s3  ;;  %p3859_p3 = scmp.lt.s32.totalorder %s398_s27, %s398_s27 }
 0x107   : > { %p3860_p9 = scmp.lt.s32.totalorder %s3858_s12, %s3851_s3 }
 0x108   : > { %p3854_p8 = pnand %p3852_p5, %p4455_p12 }
 0x109   : > { %p3861_p6 = por %p3860_p9, %p3859_p3 }
 0x10a   : > { %p3855_p7 = pneg %p3854_p8 }
 0x10c   : > { %p3862_p13 = pnand %p3861_p6, %p3855_p7 }
 0x10e   : > { %3865 = shalt.err (!%p3862_p13)
}
 0x10f   : > { %3446 = dma.hbm_to_vmem [thread:$0]  (!%p5557_p10), %s5559_s6, 16, %s398_s27, [#allocation14]  }
 0x110   : > { %s4293_s5 = smov [#allocation18]   ;;  %s4294_s22 = smov [#allocation21]  }
 0x111   : > { %s421_s19 = sshll.u32 %s4293_s5, 4  ;;  %s445_s11 = sshll.u32 %s4294_s22, 4  ;;  %s422_s19 = int_to_ptr.vmem [resolvable:$true] %s421_s19  ;;  %s446_s11 = int_to_ptr.vmem [resolvable:$true] %s445_s11 }
 0x112   : > { %s3866_s15 = scalar_lea.hbm %s5487_s8, 32 }
 0x113   : > { %p3867_p2 = scmp.ne.s32.totalorder %s5487_s8, %s3866_s15  ;;  %p3873_p0 = scmp.lt.u32.totalorder %s3866_s15, %s5487_s8 }
 0x115   : > { %p3869_p4 = pnand %p3867_p2, %p4455_p12 }
 0x117   : > { %p3870_p11 = pneg %p3869_p4 }
 0x119   : > { %p3875_p1 = pnand %p3873_p0, %p3870_p11 }
 0x11b   : > { %3878 = shalt.err (!%p3875_p1)
}
 0x11c   : > { %s3879_s27 = scalar_lea.vmem %s422_s19, 32  ;;  %p3887_p3 = scmp.lt.s32.totalorder %s422_s19, %s422_s19 }
 0x11d   : > { %p3880_p5 = scmp.ne.s32.totalorder %s422_s19, %s3879_s27  ;;  %p3888_p9 = scmp.lt.s32.totalorder %s3879_s27, %s3879_s27 }
 0x11f   : > { %p3882_p8 = pnand %p3880_p5, %p4455_p12  ;;  %p3889_p6 = por %p3888_p9, %p3887_p3 }
 0x121   : > { %p3883_p7 = pneg %p3882_p8 }
 0x123   : > { %p3890_p13 = pnand %p3889_p6, %p3883_p7 }
 0x125   : > { %3893 = shalt.err (!%p3890_p13)
}
 0x126   : > { %3452 = dma.hbm_to_vmem [thread:$0]  (!%p5557_p10), %s5487_s8, 32, %s422_s19, [#allocation17]  }
 0x127   : > { %s3894_s22 = scalar_lea.hbm %s5489_s10, 32 }
 0x128   : > { %p3895_p2 = scmp.ne.s32.totalorder %s5489_s10, %s3894_s22  ;;  %p3901_p0 = scmp.lt.u32.totalorder %s3894_s22, %s5489_s10 }
 0x12a   : > { %p3897_p4 = pnand %p3895_p2, %p4455_p12 }
 0x12c   : > { %p3898_p11 = pneg %p3897_p4 }
 0x12e   : > { %p3903_p1 = pnand %p3901_p0, %p3898_p11 }
 0x130   : > { %3906 = shalt.err (!%p3903_p1)
}
 0x131   : > { %s3907_s14 = scalar_lea.vmem %s446_s11, 32  ;;  %p3915_p3 = scmp.lt.s32.totalorder %s446_s11, %s446_s11 }
 0x132   : > { %p3908_p5 = scmp.ne.s32.totalorder %s446_s11, %s3907_s14  ;;  %p3916_p9 = scmp.lt.s32.totalorder %s3907_s14, %s3907_s14 }
 0x134   : > { %p3910_p8 = pnand %p3908_p5, %p4455_p12  ;;  %p3917_p6 = por %p3916_p9, %p3915_p3 }
 0x136   : > { %p3911_p7 = pneg %p3910_p8 }
 0x138   : > { %p3918_p13 = pnand %p3917_p6, %p3911_p7 }
 0x13a   : > { %3921 = shalt.err (!%p3918_p13)
}
 0x13b   : > { %3458 = dma.hbm_to_vmem [thread:$0]  (!%p5557_p10), %s5489_s10, 32, %s446_s11, [#allocation20]  }
 0x13c   : > { %s3016_s3 = sshll.u32 %s4278_s0, 4  ;;  %s5560_s27 = sand.u32 1, %s4274_s25  }
 0x13d   : > { %s479_s12 = scalar_lea.vmem [#allocation24], %s5560_s27  ;;  %s5561_s5 = sld [smem:[#allocation76_spill]] }
 0x13e   : > { %s486_s30 = sshll.u32 %s479_s12, 4  ;;  %p5562_p2 = scmp.ne.s32.totalorder %s5552_s13, 0  ;;  %s487_s30 = int_to_ptr.vmem [resolvable:$true] %s486_s30 }
 0x140   : > { %p5563_p4 = pneg %p5562_p2 }
 0x143   : > { %s484_s22 = scalar_lea.hbm %s5561_s5, %s3016_s3  ;;  %s3927_s15 = scalar_lea.hbm %s5561_s5, 32 }
 0x144   : > { %s3922_s18 = scalar_lea.hbm %s484_s22, 16  ;;  %p3928_p10 = scmp.lt.u32.totalorder %s484_s22, %s5561_s5 }
 0x145   : > { %p3923_p12 = scmp.ne.s32.totalorder %s484_s22, %s3922_s18  ;;  %p3929_p1 = scmp.lt.u32.totalorder %s3927_s15, %s3922_s18 }
 0x146   : > { %p3931_p8 = scmp.lt.u32.totalorder %s3922_s18, %s484_s22 }
 0x147   : > { %p3925_p11 = pnand %p3923_p12, %p5563_p4  ;;  %p3930_p5 = por %p3929_p1, %p3928_p10 }
 0x149   : > { %p3926_p0 = pneg %p3925_p11  ;;  %p3932_p7 = por %p3931_p8, %p3930_p5 }
 0x14b   : > { %p3933_p3 = pnand %p3932_p7, %p3926_p0 }
 0x14d   : > { %3936 = shalt.err (!%p3933_p3)
}
 0x14e   : > { %s3937_s14 = scalar_lea.vmem %s487_s30, 16  ;;  %p5564_p6 = pmov %p5563_p4 }
 0x14f   : > { %p3938_p9 = scmp.ne.s32.totalorder %s487_s30, %s3937_s14  ;;  %s4295_s19 = smov [#allocation24]  }
 0x150   : > { %s3942_s9 = sshll.u32 %s4295_s19, 4  ;;  %s3943_s9 = int_to_ptr.vmem [resolvable:$false] %s3942_s9 }
 0x151   : > { %p3940_p13 = pnand %p3938_p9, %p5564_p6  ;;  %s3944_s3 = scalar_lea.vmem %s3943_s9, 32 }
 0x152   : > { %p3945_p4 = scmp.lt.s32.totalorder %s487_s30, %s3943_s9  ;;  %p3946_p11 = scmp.lt.s32.totalorder %s3944_s3, %s3937_s14 }
 0x153   : > { %p3941_p12 = pneg %p3940_p13 }
 0x154   : > { %p3947_p1 = por %p3946_p11, %p3945_p4 }
 0x156   : > { %p3948_p10 = pnand %p3947_p1, %p3941_p12 }
 0x158   : > { %3951 = shalt.err (!%p3948_p10)
}
 0x159   : > { %3465 = dma.hbm_to_vmem [thread:$0]  (!%p5562_p2), %s484_s22, 16, %s487_s30, %s4601_s20  }
 0x15a   : > { %s5565_s27 = sld [smem:[#allocation63_spill]] }
 0x160   : > { %p5566_p0 = scmp.ne.s32.totalorder %s5565_s27, 0 }
 0x161   : > { %p5567_p5 = scmp.eq.s32.totalorder (!%p5566_p0), %s4422_s28, 0 }
 0x162   : > { %495 = sbr.rel (%p5566_p0) target bundleno = 2782 (0xade), region = 64 }
 0x169   : > { %4217 = dma.done.wait (%p5567_p5), [#allocation8], 128   ;;  %p5568_p8 = pmov %p5567_p5 }
 0x16a   : > { %p5569_p7 = pmov %p5567_p5 }
 0x16b   : > { %4219 = vsyncadd (%p5568_p8), [#allocation8], 4294967168 }
 0x16c   : > { %4221 = dma.done.wait (%p5569_p7), [#allocation11], 3072   ;;  %p5570_p3 = pmov %p5567_p5 }
 0x16e   : > { %4223 = vsyncadd (%p5570_p3), [#allocation11], 4294964224  ;;  %p5571_p9 = pmov %p5570_p3 }
 0x16f   : > { %p5572_p2 = pmov %p5570_p3 }
 0x170   : > { %4225 = dma.done.wait (%p5571_p9), [#allocation14], 1040  }
 0x171   : > { %4227 = vsyncadd (%p5572_p2), [#allocation14], 4294966256  ;;  %p5573_p6 = pmov %p5572_p2 }
 0x172   : > { %p5574_p13 = pmov %p5572_p2 }
 0x173   : > { %4229 = dma.done.wait (%p5573_p6), [#allocation17], 3104  }
 0x174   : > { %4231 = vsyncadd (%p5574_p13), [#allocation17], 4294964192  ;;  %p5575_p12 = pmov %p5572_p2 }
 0x175   : > { %p5576_p4 = pmov %p5572_p2 }
 0x176   : > { %4233 = dma.done.wait (%p5575_p12), [#allocation20], 2080  }
 0x177   : > { %4235 = vsyncadd (%p5576_p4), [#allocation20], 4294965216  ;;  %s533_s13 = sand.u32 1, %s4422_s28   ;;  %s4771_s20 = sand.u32 1, %s4270_s24  }
 0x178   : > { %s3384_s12 = smul.u32 160, %s4771_s20  ;;  %s534_s30 = scalar_lea.sflag [#allocation23], %s533_s13 }
 0x179   : > { %p5577_p11 = scmp.ne.s32.totalorder %s5547_s1, 0 }
 0x17a   : > { %s4774_s29 = scalar_lea.vmem [#allocation22], %s3384_s12 }
 0x17b   : > { %4237 = dma.done.wait (%p5577_p11), %s534_s30, 2576  }
 0x17c   : > { %4239 = vsyncadd (%p5577_p11), %s534_s30, 4294964720  ;;  %s3027_s26 = sshll.u32 %s4771_s20, 3  ;;  %p5578_p1 = scmp.ne.s32.totalorder %s4422_s28, 0 }
 0x17d   : > { %s4782_s18 = scalar_lea.vmem [#allocation25], %s3027_s26  ;;  %s594_s16 = sld [smem:[#allocation6]] (!%p5578_p1) }
 0x17e   : > { %593 = sbr.rel (%p5578_p1) target bundleno = 2507 (0x9cb), region = 112  ;;  %s4296_s7 = smov (!%p5578_p1), [#allocation2]  }
 0x17f   : > { %s604_s15 = sshll.u32 (!%p5578_p1), %s4296_s7, 4  ;;  %s4786_s11 = sld [smem:[#allocation6 + $0x1]] (!%p5578_p1)  ;;  %s4788_s15 = int_to_ptr.vmem [resolvable:$true] %s604_s15 }
 0x180   : > { %s4297_s21 = smov (!%p5578_p1), [#allocation2 + $0x1]   ;;  %s4790_s14 = sld [smem:[#allocation6 + $0x2]] (!%p5578_p1) }
 0x181   : > { %s620_s1 = sshll.u32 (!%p5578_p1), %s4297_s21, 4  ;;  %s4298_s19 = smov (!%p5578_p1), [#allocation2 + $0x2]   ;;  %s4792_s1 = int_to_ptr.vmem [resolvable:$true] %s620_s1 }
 0x182   : > { %s636_s9 = sshll.u32 (!%p5578_p1), %s4298_s19, 4  ;;  %s4794_s3 = sld [smem:[#allocation6 + $0x3]] (!%p5578_p1)  ;;  %s4796_s9 = int_to_ptr.vmem [resolvable:$true] %s636_s9 }
 0x183   : > { %s3029_s27 = sshll.u32 (!%p5578_p1), %s594_s16, 4  ;;  %s5579_s30 = sld [smem:[#allocation67_spill]] (!%p5578_p1) }
 0x185   : > { %s3031_s7 = sshll.u32 %s4786_s11, 4 }
 0x189   : > { %s596_s26 = scalar_lea.hbm %s5579_s30, %s3029_s27  ;;  %s4805_s4 = scalar_lea.hbm %s5579_s30, 4096 }
 0x18a   : > { %s3952_s22 = scalar_lea.hbm %s596_s26, 16  ;;  %p3955_p0 = scmp.lt.u32.totalorder %s596_s26, %s5579_s30 }
 0x18b   : > { %p3953_p10 = scmp.ne.s32.totalorder %s596_s26, %s3952_s22  ;;  %p3956_p5 = scmp.lt.u32.totalorder %s4805_s4, %s3952_s22 }
 0x18c   : > { %p3958_p7 = scmp.lt.u32.totalorder %s3952_s22, %s596_s26 }
 0x18d   : > { %p3957_p8 = por %p3956_p5, %p3955_p0 }
 0x18f   : > { %p3959_p3 = por %p3958_p7, %p3957_p8 }
 0x191   : > { %p3960_p9 = pnand %p3959_p3, %p3953_p10 }
 0x193   : > { %3963 = shalt.err (!%p3960_p9)  }
 0x194   : > { %s3964_s16 = scalar_lea.vmem %s4788_s15, 16  ;;  %s4814_s2 = scalar_lea.vmem %s4788_s15, 128 }
 0x195   : > { %p3965_p2 = scmp.ne.s32.totalorder %s4788_s15, %s3964_s16  ;;  %p3969_p6 = scmp.lt.s32.totalorder %s4788_s15, %s4788_s15 }
 0x196   : > { %p3970_p13 = scmp.lt.s32.totalorder %s4814_s2, %s3964_s16 }
 0x198   : > { %p3971_p12 = por %p3970_p13, %p3969_p6 }
 0x19a   : > { %p3972_p4 = pnand %p3971_p12, %p3965_p2 }
 0x19c   : > { %3975 = shalt.err (!%p3972_p4)  }
 0x19d   : > { %607 = dma.hbm_to_vmem [thread:$0]  %s596_s26, 16, %s4788_s15, [#allocation4] }
 0x19e   : > { %s610_s22 = scalar_lea.hbm %s5579_s30, %s3031_s7  ;;  %s3033_s11 = sshll.u32 %s4790_s14, 4 }
 0x19f   : > { %s3976_s19 = scalar_lea.hbm %s610_s22, 16  ;;  %p3979_p1 = scmp.lt.u32.totalorder %s610_s22, %s5579_s30 }
 0x1a0   : > { %p3977_p11 = scmp.ne.s32.totalorder %s610_s22, %s3976_s19  ;;  %p3980_p10 = scmp.lt.u32.totalorder %s4805_s4, %s3976_s19 }
 0x1a1   : > { %p3982_p5 = scmp.lt.u32.totalorder %s3976_s19, %s610_s22 }
 0x1a2   : > { %p3981_p0 = por %p3980_p10, %p3979_p1 }
 0x1a4   : > { %p3983_p8 = por %p3982_p5, %p3981_p0 }
 0x1a6   : > { %p3984_p7 = pnand %p3983_p8, %p3977_p11 }
 0x1a8   : > { %3987 = shalt.err (!%p3984_p7)  }
 0x1a9   : > { %s3988_s12 = scalar_lea.vmem %s4792_s1, 16  ;;  %p3993_p9 = scmp.lt.s32.totalorder %s4792_s1, %s4788_s15 }
 0x1aa   : > { %p3989_p3 = scmp.ne.s32.totalorder %s4792_s1, %s3988_s12  ;;  %p3994_p2 = scmp.lt.s32.totalorder %s4814_s2, %s3988_s12 }
 0x1ac   : > { %p3995_p6 = por %p3994_p2, %p3993_p9 }
 0x1ae   : > { %p3996_p13 = pnand %p3995_p6, %p3989_p3 }
 0x1b0   : > { %3999 = shalt.err (!%p3996_p13)  }
 0x1b1   : > { %623 = dma.hbm_to_vmem [thread:$0]  %s610_s22, 16, %s4792_s1, [#allocation4 + $0x1] }
 0x1b2   : > { %s626_s7 = scalar_lea.hbm %s5579_s30, %s3033_s11  ;;  %s3035_s21 = sshll.u32 %s4794_s3, 4 }
 0x1b3   : > { %s4000_s16 = scalar_lea.hbm %s626_s7, 16  ;;  %p4003_p4 = scmp.lt.u32.totalorder %s626_s7, %s5579_s30 }
 0x1b4   : > { %p4001_p12 = scmp.ne.s32.totalorder %s626_s7, %s4000_s16  ;;  %p4004_p11 = scmp.lt.u32.totalorder %s4805_s4, %s4000_s16 }
 0x1b5   : > { %p4006_p10 = scmp.lt.u32.totalorder %s4000_s16, %s626_s7 }
 0x1b6   : > { %p4005_p1 = por %p4004_p11, %p4003_p4 }
 0x1b8   : > { %p4007_p0 = por %p4006_p10, %p4005_p1 }
 0x1ba   : > { %p4008_p5 = pnand %p4007_p0, %p4001_p12 }
 0x1bc   : > { %4011 = shalt.err (!%p4008_p5)  }
 0x1bd   : > { %s4012_s1 = scalar_lea.vmem %s4796_s9, 16  ;;  %p4017_p7 = scmp.lt.s32.totalorder %s4796_s9, %s4788_s15 }
 0x1be   : > { %p4013_p8 = scmp.ne.s32.totalorder %s4796_s9, %s4012_s1  ;;  %p4018_p3 = scmp.lt.s32.totalorder %s4814_s2, %s4012_s1 }
 0x1c0   : > { %p4019_p9 = por %p4018_p3, %p4017_p7 }
 0x1c2   : > { %p4020_p2 = pnand %p4019_p9, %p4013_p8 }
 0x1c4   : > { %4023 = shalt.err (!%p4020_p2)  }
 0x1c5   : > { %639 = dma.hbm_to_vmem [thread:$0]  %s626_s7, 16, %s4796_s9, [#allocation4 + $0x2] }
 0x1c6   : > { %s642_s11 = scalar_lea.hbm %s5579_s30, %s3035_s21  ;;  %s4299_s19 = smov [#allocation2 + $0x3]  }
 0x1c7   : > { %s652_s27 = sshll.u32 %s4299_s19, 4  ;;  %s4851_s13 = sld [smem:[#allocation6 + $0x4]]  ;;  %s653_s27 = int_to_ptr.vmem [resolvable:$true] %s652_s27 }
 0x1c8   : > { %s4024_s12 = scalar_lea.hbm %s642_s11, 16  ;;  %p4027_p13 = scmp.lt.u32.totalorder %s642_s11, %s5579_s30 }
 0x1c9   : > { %p4025_p6 = scmp.ne.s32.totalorder %s642_s11, %s4024_s12  ;;  %p4028_p12 = scmp.lt.u32.totalorder %s4805_s4, %s4024_s12 }
 0x1ca   : > { %p4030_p11 = scmp.lt.u32.totalorder %s4024_s12, %s642_s11 }
 0x1cb   : > { %p4029_p4 = por %p4028_p12, %p4027_p13 }
 0x1cd   : > { %p4031_p1 = por %p4030_p11, %p4029_p4 }
 0x1cf   : > { %p4032_p10 = pnand %p4031_p1, %p4025_p6 }
 0x1d1   : > { %4035 = shalt.err (!%p4032_p10)  }
 0x1d2   : > { %s4036_s9 = scalar_lea.vmem %s653_s27, 16  ;;  %p4041_p5 = scmp.lt.s32.totalorder %s653_s27, %s4788_s15 }
 0x1d3   : > { %p4037_p0 = scmp.ne.s32.totalorder %s653_s27, %s4036_s9  ;;  %p4042_p8 = scmp.lt.s32.totalorder %s4814_s2, %s4036_s9 }
 0x1d5   : > { %p4043_p7 = por %p4042_p8, %p4041_p5 }
 0x1d7   : > { %p4044_p3 = pnand %p4043_p7, %p4037_p0 }
 0x1d9   : > { %4047 = shalt.err (!%p4044_p3)  }
 0x1da   : > { %655 = dma.hbm_to_vmem [thread:$0]  %s642_s11, 16, %s653_s27, [#allocation4 + $0x3] }
 0x1db   : > { %s4300_s7 = smov [#allocation2 + $0x4]   ;;  %s4859_s16 = sld [smem:[#allocation6 + $0x5]] }
 0x1dc   : > { %s668_s21 = sshll.u32 %s4300_s7, 4  ;;  %s4301_s6 = smov [#allocation2 + $0x5]   ;;  %s669_s21 = int_to_ptr.vmem [resolvable:$true] %s668_s21 }
 0x1dd   : > { %s684_s5 = sshll.u32 %s4301_s6, 4  ;;  %s4861_s1 = sld [smem:[#allocation6 + $0x6]]  ;;  %s4864_s5 = int_to_ptr.vmem [resolvable:$true] %s684_s5 }
 0x1de   : > { %s3037_s3 = sshll.u32 %s4851_s13, 4 }
 0x1df   : > { %s658_s12 = scalar_lea.hbm %s5579_s30, %s3037_s3 }
 0x1e0   : > { %s4048_s14 = scalar_lea.hbm %s658_s12, 16  ;;  %p4051_p2 = scmp.lt.u32.totalorder %s658_s12, %s5579_s30 }
 0x1e1   : > { %p4049_p9 = scmp.ne.s32.totalorder %s658_s12, %s4048_s14  ;;  %p4052_p6 = scmp.lt.u32.totalorder %s4805_s4, %s4048_s14 }
 0x1e2   : > { %p4054_p12 = scmp.lt.u32.totalorder %s4048_s14, %s658_s12 }
 0x1e3   : > { %p4053_p13 = por %p4052_p6, %p4051_p2 }
 0x1e5   : > { %p4055_p4 = por %p4054_p12, %p4053_p13 }
 0x1e7   : > { %p4056_p11 = pnand %p4055_p4, %p4049_p9 }
 0x1e9   : > { %4059 = shalt.err (!%p4056_p11)  }
 0x1ea   : > { %s4060_s26 = scalar_lea.vmem %s669_s21, 16  ;;  %p4065_p10 = scmp.lt.s32.totalorder %s669_s21, %s4788_s15 }
 0x1eb   : > { %p4061_p1 = scmp.ne.s32.totalorder %s669_s21, %s4060_s26  ;;  %p4066_p0 = scmp.lt.s32.totalorder %s4814_s2, %s4060_s26 }
 0x1ed   : > { %p4067_p5 = por %p4066_p0, %p4065_p10 }
 0x1ef   : > { %p4068_p8 = pnand %p4067_p5, %p4061_p1 }
 0x1f1   : > { %4071 = shalt.err (!%p4068_p8)  }
 0x1f2   : > { %671 = dma.hbm_to_vmem [thread:$0]  %s658_s12, 16, %s669_s21, [#allocation4 + $0x4] }
 0x1f3   : > { %s3039_s13 = sshll.u32 %s4859_s16, 4  ;;  %s4302_s9 = smov [#allocation2 + $0x6]  }
 0x1f4   : > { %s700_s7 = sshll.u32 %s4302_s9, 4  ;;  %s674_s22 = scalar_lea.hbm %s5579_s30, %s3039_s13  ;;  %s4879_s7 = int_to_ptr.vmem [resolvable:$true] %s700_s7 }
 0x1f5   : > { %s4072_s19 = scalar_lea.hbm %s674_s22, 16  ;;  %p4075_p3 = scmp.lt.u32.totalorder %s674_s22, %s5579_s30 }
 0x1f6   : > { %p4073_p7 = scmp.ne.s32.totalorder %s674_s22, %s4072_s19  ;;  %p4076_p9 = scmp.lt.u32.totalorder %s4805_s4, %s4072_s19 }
 0x1f7   : > { %p4078_p6 = scmp.lt.u32.totalorder %s4072_s19, %s674_s22 }
 0x1f8   : > { %p4077_p2 = por %p4076_p9, %p4075_p3 }
 0x1fa   : > { %p4079_p13 = por %p4078_p6, %p4077_p2 }
 0x1fc   : > { %p4080_p12 = pnand %p4079_p13, %p4073_p7 }
 0x1fe   : > { %4083 = shalt.err (!%p4080_p12)  }
 0x1ff   : > { %s4084_s21 = scalar_lea.vmem %s4864_s5, 16  ;;  %p4089_p11 = scmp.lt.s32.totalorder %s4864_s5, %s4788_s15 }
 0x200   : > { %p4085_p4 = scmp.ne.s32.totalorder %s4864_s5, %s4084_s21  ;;  %p4090_p1 = scmp.lt.s32.totalorder %s4814_s2, %s4084_s21 }
 0x202   : > { %p4091_p10 = por %p4090_p1, %p4089_p11 }
 0x204   : > { %p4092_p0 = pnand %p4091_p10, %p4085_p4 }
 0x206   : > { %4095 = shalt.err (!%p4092_p0)  }
 0x207   : > { %687 = dma.hbm_to_vmem [thread:$0]  %s674_s22, 16, %s4864_s5, [#allocation4 + $0x5] }
 0x208   : > { %s3041_s16 = sshll.u32 %s4861_s1, 4  ;;  %s3042_s12 = sld [smem:[#allocation6 + $0x7]] }
 0x209   : > { %s690_s13 = scalar_lea.hbm %s5579_s30, %s3041_s16 }
 0x20a   : > { %s4096_s9 = scalar_lea.hbm %s690_s13, 16  ;;  %p4099_p8 = scmp.lt.u32.totalorder %s690_s13, %s5579_s30 }
 0x20b   : > { %p4097_p5 = scmp.ne.s32.totalorder %s690_s13, %s4096_s9  ;;  %p4100_p7 = scmp.lt.u32.totalorder %s4805_s4, %s4096_s9 }
 0x20c   : > { %p4102_p9 = scmp.lt.u32.totalorder %s4096_s9, %s690_s13 }
 0x20d   : > { %p4101_p3 = por %p4100_p7, %p4099_p8 }
 0x20f   : > { %p4103_p2 = por %p4102_p9, %p4101_p3 }
 0x211   : > { %p4104_p6 = pnand %p4103_p2, %p4097_p5 }
 0x213   : > { %4107 = shalt.err (!%p4104_p6)  }
 0x214   : > { %s4108_s5 = scalar_lea.vmem %s4879_s7, 16  ;;  %p4113_p12 = scmp.lt.s32.totalorder %s4879_s7, %s4788_s15 }
 0x215   : > { %p4109_p13 = scmp.ne.s32.totalorder %s4879_s7, %s4108_s5  ;;  %p4114_p4 = scmp.lt.s32.totalorder %s4814_s2, %s4108_s5 }
 0x217   : > { %p4115_p11 = por %p4114_p4, %p4113_p12 }
 0x219   : > { %p4116_p1 = pnand %p4115_p11, %p4109_p13 }
 0x21b   : > { %4119 = shalt.err (!%p4116_p1)  }
 0x21c   : > { %703 = dma.hbm_to_vmem [thread:$0]  %s690_s13, 16, %s4879_s7, [#allocation4 + $0x6] }
 0x21d   : > { %s4303_s1 = smov [#allocation2 + $0x7]   ;;  %s3043_s19 = sshll.u32 %s3042_s12, 4 }
 0x21e   : > { %s716_s22 = sshll.u32 %s4303_s1, 4  ;;  %s706_s21 = scalar_lea.hbm %s5579_s30, %s3043_s19  ;;  %s717_s22 = int_to_ptr.vmem [resolvable:$true] %s716_s22 }
 0x21f   : > { %s4120_s16 = scalar_lea.hbm %s706_s21, 16  ;;  %p4123_p0 = scmp.lt.u32.totalorder %s706_s21, %s5579_s30 }
 0x220   : > { %p4121_p10 = scmp.ne.s32.totalorder %s706_s21, %s4120_s16  ;;  %p4124_p5 = scmp.lt.u32.totalorder %s4805_s4, %s4120_s16 }
 0x221   : > { %p4126_p7 = scmp.lt.u32.totalorder %s4120_s16, %s706_s21 }
 0x222   : > { %p4125_p8 = por %p4124_p5, %p4123_p0 }
 0x224   : > { %p4127_p3 = por %p4126_p7, %p4125_p8 }
 0x226   : > { %p4128_p9 = pnand %p4127_p3, %p4121_p10 }
 0x228   : > { %4131 = shalt.err (!%p4128_p9)  }
 0x229   : > { %s4132_s7 = scalar_lea.vmem %s717_s22, 16  ;;  %p4137_p6 = scmp.lt.s32.totalorder %s717_s22, %s4788_s15 }
 0x22a   : > { %p4133_p2 = scmp.ne.s32.totalorder %s717_s22, %s4132_s7  ;;  %p4138_p13 = scmp.lt.s32.totalorder %s4814_s2, %s4132_s7 }
 0x22c   : > { %p4139_p12 = por %p4138_p13, %p4137_p6 }
 0x22e   : > { %p4140_p4 = pnand %p4139_p12, %p4133_p2 }
 0x230   : > { %4143 = shalt.err (!%p4140_p4)  }
 0x231   : > { %719 = dma.hbm_to_vmem [thread:$0]  %s706_s21, 16, %s717_s22, [#allocation4 + $0x7] }
 0x232   : > { %4240 = dma.done.wait [#allocation4], 16 }
 0x233   : > { %4241 = vsyncadd [#allocation4], 4294967280 }
 0x234   : > { %4242 = dma.done.wait [#allocation4 + $0x1], 16 }
 0x235   : > { %4243 = vsyncadd [#allocation4 + $0x1], 4294967280 }
 0x236   : > { %4244 = dma.done.wait [#allocation4 + $0x2], 16 }
 0x237   : > { %4245 = vsyncadd [#allocation4 + $0x2], 4294967280 }
 0x238   : > { %4246 = dma.done.wait [#allocation4 + $0x3], 16 }
 0x239   : > { %4247 = vsyncadd [#allocation4 + $0x3], 4294967280 }
 0x23a   : > { %4248 = dma.done.wait [#allocation4 + $0x4], 16 }
 0x23b   : > { %4249 = vsyncadd [#allocation4 + $0x4], 4294967280 }
 0x23c   : > { %4250 = dma.done.wait [#allocation4 + $0x5], 16 }
 0x23d   : > { %4251 = vsyncadd [#allocation4 + $0x5], 4294967280 }
 0x23e   : > { %4252 = dma.done.wait [#allocation4 + $0x6], 16 }
 0x23f   : > { %4253 = vsyncadd [#allocation4 + $0x6], 4294967280 }
 0x240   : > { %4254 = dma.done.wait [#allocation4 + $0x7], 16 }
 0x241   : > { %4255 = vsyncadd [#allocation4 + $0x7], 4294967280  ;;  %v5519_v0 = vmov 0.0|0.0   ;;  %vm4305_vm0 = vmmov 0   ;;  %v5521_v1 = vmov 0.0   ;;  %v755_v2 = vld [vmem:[#allocation12] sm:$0xff]  ;;  %v1043_v53 = vlaneseq }
 0x242   : > { %3261 = vmatprep.subr.bf16.mxu0 %v5519_v0  ;;  %3162 = vmatprep.mubr.msk.f32.mxu0 %vm4305_vm0, %v5521_v1  ;;  %v756_v3 = vld [vmem:[#allocation12 + $0x8] sm:$0xff]  ;;  %v837_v4 = vld [vmem:[#allocation13] sm:$0xff]  ;;  %v757_v7 = vld [vmem:[#allocation12 + $0x10] sm:$0xff]  ;;  %vm763_vm1 = vcmask 523264   ;;  %v4307_v51 = vmov 1966171168  }
 0x243   : > { %v3262_v5 = vpack.c.bf16 %v756_v3, %v755_v2  ;;  %v838_v6 = vld [vmem:[#allocation13 + $0x8] sm:$0xff]  ;;  %v758_v8 = vld [vmem:[#allocation12 + $0x18] sm:$0xff]  ;;  %v839_v10 = vld [vmem:[#allocation13 + $0x10] sm:$0xff]  ;;  %v1041_v52 = vunpack.c.l.s4 %v4307_v51  ;;  %v4999_v55 = vshrl.u32 %v1043_v53, 7  ;;  %vm1183_vm2 = vcmask 261120   ;;  %s4309_s4 = smov 32  }
 0x244   : > { %v3273_v9 = vpack.c.bf16 %v838_v6, %v837_v4  ;;  %v840_v11 = vld [vmem:[#allocation13 + $0x18] sm:$0xff]  ;;  %v3265_v12 = vpack.c.bf16 %v758_v8, %v757_v7  ;;  %v841_v14 = vld [vmem:[#allocation13 + $0x20] sm:$0xff]  ;;  %v842_v15 = vld [vmem:[#allocation13 + $0x28] sm:$0xff]  ;;  %vm1259_vm3 = vcmask 130112   ;;  %vm1324_vm4 = vcmask 1041409   ;;  %s4310_s15 = smov 64  }
 0x245   : > { %3263 = vmatpush3.bf16.msra.mxu0 %v3262_v5  ;;  %v3277_v13 = vpack.c.bf16 %v840_v11, %v839_v10  ;;  %v759_v16 = vld [vmem:[#allocation12 + $0x20] sm:$0xff]  ;;  %v760_v17 = vld [vmem:[#allocation12 + $0x28] sm:$0xff]  ;;  %v843_v18 = vld [vmem:[#allocation13 + $0x30] sm:$0xff]  ;;  %v3281_v20 = vpack.c.bf16 %v842_v15, %v841_v14  ;;  %v1042_v54 = vunpack.c.0.s8 %v1041_v52  ;;  %v5003_v60 = vsub.s32 0, %v4999_v55 }
 0x246   : > { %3274 = vmatprep.subr.bf16.mxu1 %v3273_v9  ;;  %3264 = vmatprep.subr.bf16.mxu0 %v5519_v0  ;;  %v739_v19 = vld [vmem:[#allocation10] sm:$0xff]  ;;  %v761_v21 = vld [vmem:[#allocation12 + $0x30] sm:$0xff]  ;;  %v762_v22 = vld [vmem:[#allocation12 + $0x38] sm:$0xff]  ;;  %v3268_v26 = vpack.c.bf16 %v760_v17, %v759_v16  ;;  %vm1326_vm5 = vcmask 1042434   ;;  %vm1328_vm6 = vcmask 1043459   ;;  %vm1330_vm7 = vcmask 1044484  }
 0x247   : > { %3276 = vmatpush3.bf16.msra.mxu1 %v3273_v9  ;;  %v844_v23 = vld [vmem:[#allocation13 + $0x38] sm:$0xff]  ;;  %3181 = vmatprep.mubr.msk.f32.mxu1 %vm763_vm1, %v739_v19  ;;  %v4919_v24 = vld [vmem:[#allocation10 + $0x10] sm:$0xff]  ;;  %v4925_v28 = vld [vmem:[#allocation10 + $0x20] sm:$0xff]  ;;  %v3271_v45 = vpack.c.bf16 %v762_v22, %v761_v21  ;;  %v1045_v56 = vsub.s32 %v1042_v54, %v4999_v55  ;;  %vm1332_vm8 = vcmask 1045509   ;;  %vm1334_vm9 = vcmask 1046534  }
 0x248   : > { %3278 = vmatprep.subr.bf16.mxu1 %v3277_v13  ;;  %v4921_v25 = vld [vmem:[#allocation10 + $0x18] sm:$0xff]  ;;  %v4927_v29 = vld [vmem:[#allocation10 + $0x28] sm:$0xff]  ;;  %v4929_v30 = vld [vmem:[#allocation10 + $0x30] sm:$0xff]  ;;  %v3285_v40 = vpack.c.bf16 %v844_v23, %v843_v18  ;;  %vm1336_vm10 = vcmask 1047559   ;;  %vm1339_vm11 = vcmask 130048   ;;  %vm2411_vm12 = vcmask 785408  }
 0x249   : > { %3266 = vmatpush3.bf16.msra.mxu0 %v3265_v12  ;;  %v4934_v32 = vld [vmem:[#allocation10 + $0x38] sm:$0xff]  ;;  %v4936_v33 = vld [vmem:[#allocation10 + $0x40] sm:$0xff]  ;;  %v4938_v34 = vld [vmem:[#allocation10 + $0x48] sm:$0xff] }
 0x24a   : > { %3267 = vmatprep.subr.bf16.mxu0 %v5519_v0  ;;  %v4944_v37 = vld [vmem:[#allocation10 + $0x50] sm:$0xff]  ;;  %v4946_v38 = vld [vmem:[#allocation10 + $0x58] sm:$0xff]  ;;  %v4948_v39 = vld [vmem:[#allocation10 + $0x60] sm:$0xff] }
 0x24b   : > { %3280 = vmatpush3.bf16.msra.mxu1 %v3277_v13  ;;  %v4952_v42 = vld [vmem:[#allocation10 + $0x68] sm:$0xff]  ;;  %v4954_v43 = vld [vmem:[#allocation10 + $0x70] sm:$0xff]  ;;  %v4956_v44 = vld [vmem:[#allocation10 + $0x78] sm:$0xff] }
 0x24c   : > { %3282 = vmatprep.subr.bf16.mxu1 %v3281_v20  ;;  %v740_v48 = vld [vmem:[#allocation10 + $0x8] sm:$0xff]  ;;  %v738_v49 = vld [vmem:[#allocation7] sm:$0xff]  ;;  %v5006_v7 = vld [vmem:[#allocation15] ss:$0 sm:$0xff] }
 0x24d   : > { %3269 = vmatpush3.bf16.msra.mxu0 %v3268_v26  ;;  %v3290_v50 = vpack.c.bf16 %v740_v48, %v739_v19 }
 0x24e   : > { %3270 = vmatprep.subr.bf16.mxu0 %v5519_v0 }
 0x24f   : > { %3284 = vmatpush3.bf16.msra.mxu1 %v3281_v20 }
 0x250   : > { %3286 = vmatprep.subr.bf16.mxu1 %v3285_v40 }
 0x251   : > { %3272 = vmatpush3.bf16.msra.mxu0 %v3271_v45 }
 0x252   : > { %3289 = vmatprep.subr.bf16.mxu0 %v5519_v0 }
 0x253   : > { %3288 = vmatpush3.bf16.msra.mxu1 %v3285_v40 }
 0x254   : > { %3163 = vmatmul.mubr.msk.f32.vlgmr.msra.gmra.mrb[0].mxu0 %vm763_vm1, %v738_v49 }
 0x255   : > { %3291 = vmatpush3.bf16.msra.mxu0 %v3290_v50  ;;  %3209 = vmatprep.mubr.msk.f32.mxu0 %vm4305_vm0, %v5521_v1 }
 0x256   : > { %3182 = vmatmul.mubr.msk.f32.vlgmr.msra.gmra.mrb[0].mxu1 %vm763_vm1, %v740_v48  ;;  %3292 = vmatprep.subr.bf16.mxu0 %v5519_v0 }
 0x257   : > { %3184 = vmatprep.mubr.msk.f32.mxu1 %vm763_vm1, %v4919_v24 }
 0x25a   : > { %3185 = vmatmul.mubr.msk.f32.gmra.mrb[2].mxu1 %vm763_vm1, %v4921_v25 }
 0x25b   : > { %3187 = vmatprep.mubr.msk.f32.mxu1 %vm763_vm1, %v4925_v28 }
 0x25e   : > { %3188 = vmatmul.mubr.msk.f32.gmra.mrb[4].mxu1 %vm763_vm1, %v4927_v29 }
 0x25f   : > { %3190 = vmatprep.mubr.msk.f32.mxu1 %vm763_vm1, %v4929_v30 }
 0x262   : > { %3191 = vmatmul.mubr.msk.f32.gmra.mrb[6].mxu1 %vm763_vm1, %v4934_v32 }
 0x263   : > { %3193 = vmatprep.mubr.msk.f32.mxu1 %vm763_vm1, %v4936_v33 }
 0x266   : > { %3194 = vmatmul.mubr.msk.f32.gmra.mrb[8].mxu1 %vm763_vm1, %v4938_v34 }
 0x267   : > { %3196 = vmatprep.mubr.msk.f32.mxu1 %vm763_vm1, %v4944_v37 }
 0x26a   : > { %3197 = vmatmul.mubr.msk.f32.gmra.mrb[10].mxu1 %vm763_vm1, %v4946_v38 }
 0x26b   : > { %3199 = vmatprep.mubr.msk.f32.mxu1 %vm763_vm1, %v4948_v39 }
 0x26e   : > { %3200 = vmatmul.mubr.msk.f32.gmra.mrb[12].mxu1 %vm763_vm1, %v4952_v42 }
 0x26f   : > { %3202 = vmatprep.mubr.msk.f32.mxu1 %vm763_vm1, %v4954_v43 }
 0x272   : > { %3203 = vmatmul.mubr.msk.f32.gmra.mrb[14].mxu1 %vm763_vm1, %v4956_v44 }
 0x273   : > { %2479 = vmatprep.mubr.f32.mxu1 %v5521_v1 }
 0x327   : > { %v833_v57 = vpop.f32.mrb[0].mxu0 }
 0x328   : > { %v1046_v58 = vrot.slane %v833_v57, %v1045_v56  ;;  %v3164_v59 = vpop.f32.mrb[1].mxu0  ;;  %v1039_v3 = vcombine.high %v833_v57, %v833_v57 }
 0x329   : > { %v3183_v61 = vpop.f32.mrb[0].mxu1 }
 0x32a   : > { %v1054_v62 = vcombine.high %v1046_v58, %v1046_v58  ;;  %v1062_v63 = vrot.slane %v1046_v58, %v1045_v56  ;;  %v959_v2 = vpop.f32.mrb[1].mxu1  ;;  %v1053_v14 = vrot.slane %v1039_v3, %v1045_v56 }
 0x32c   : > { %v1091_v4 = vrot.slane %v1062_v63, %v5003_v60  ;;  %v1076_v5 = vrot.slane %v1054_v62, %v1045_v56  ;;  %v1084_v6 = vcombine.high %v1062_v63, %v1062_v63  ;;  %v1055_v45 = vcombine.high %v1053_v14, %v1053_v14 }
 0x32d   : > { %v3186_v8 = vpop.f32.mrb[2].mxu1  ;;  %v1069_v49 = vrot.slane %v1053_v14, %v1045_v56 }
 0x32e   : > { %v1129_v9 = vadd.f32 %v3183_v61, %v1091_v4  ;;  %v1128_v10 = vadd.f32 %v1091_v4, %v959_v2  ;;  %v1095_v11 = vrot.slane %v1076_v5, %v5003_v60  ;;  %v969_v12 = vpop.f32.mrb[3].mxu1  ;;  %v1099_v13 = vrot.slane %v1084_v6, %v5003_v60 }
 0x32f   : > { %v1086_v15 = vcombine.high %v1076_v5, %v1076_v5  ;;  %v1107_v59 = vrot.slane %v1069_v49, %v5003_v60  ;;  %v1083_v61 = vrot.slane %v1055_v45, %v1045_v56 }
 0x330   : > { %v1152_v16 = vadd.f32 %v5006_v7, %v1129_v9  ;;  %v1151_v17 = vadd.f32 %v5006_v7, %v1128_v10  ;;  %v1131_v18 = vadd.f32 %v3186_v8, %v1095_v11  ;;  %v1130_v19 = vadd.f32 %v1095_v11, %v969_v12 }
 0x331   : > { %v3189_v20 = vpop.f32.mrb[4].mxu1  ;;  %v1103_v48 = vrot.slane %v1086_v15, %v5003_v60  ;;  %v1111_v6 = vrot.slane %v1083_v61, %v5003_v60  ;;  %v1085_v8 = vcombine.high %v1069_v49, %v1069_v49 }
 0x332   : > { %v1153_v21 = vadd.f32 %v5006_v7, %v1130_v19  ;;  %v1133_v22 = vadd.f32 %v3189_v20, %v1099_v13  ;;  %v979_v23 = vpop.f32.mrb[5].mxu1  ;;  %3557 = vtanh.f32 %v1151_v17  ;;  %v1154_v26 = vadd.f32 %v5006_v7, %v1131_v18 }
 0x333   : > { %v1132_v40 = vadd.f32 %v1099_v13, %v979_v23  ;;  %3559 = vtanh.f32 %v1152_v16  ;;  %v1115_v18 = vrot.slane %v1085_v8, %v5003_v60  ;;  %v1087_v20 = vcombine.high %v1083_v61, %v1083_v61 }
 0x334   : > { %3561 = vtanh.f32 %v1153_v21  ;;  %v1156_v57 = vadd.f32 %v5006_v7, %v1133_v22 }
 0x335   : > { %v1155_v50 = vadd.f32 %v5006_v7, %v1132_v40  ;;  %v3192_v51 = vpop.f32.mrb[6].mxu1  ;;  %3563 = vtanh.f32 %v1154_v26 }
 0x336   : > { %v1135_v52 = vadd.f32 %v3192_v51, %v1103_v48  ;;  %v989_v54 = vpop.f32.mrb[7].mxu1  ;;  %v1119_v51 = vrot.slane %v1087_v20, %v5003_v60 }
 0x337   : > { %v1134_v58 = vadd.f32 %v1103_v48, %v989_v54  ;;  %3565 = vtanh.f32 %v1155_v50 }
 0x338   : > { %3567 = vtanh.f32 %v1156_v57  ;;  %v1158_v4 = vadd.f32 %v5006_v7, %v1135_v52 }
 0x339   : > { %v1157_v62 = vadd.f32 %v5006_v7, %v1134_v58  ;;  %v3195_v63 = vpop.f32.mrb[8].mxu1 }
 0x33a   : > { %v1137_v2 = vadd.f32 %v3195_v63, %v1107_v59  ;;  %v999_v3 = vpop.f32.mrb[9].mxu1 }
 0x33b   : > { %v1136_v5 = vadd.f32 %v1107_v59, %v999_v3  ;;  %3569 = vtanh.f32 %v1157_v62 }
 0x33c   : > { %v3558_v9 = vpop.eup %3557  ;;  %3571 = vtanh.f32 %v1158_v4  ;;  %v1160_v16 = vadd.f32 %v5006_v7, %v1137_v2 }
 0x33d   : > { %v1159_v10 = vadd.f32 %v5006_v7, %v1136_v5  ;;  %v3198_v11 = vpop.f32.mrb[10].mxu1  ;;  %v3560_v56 = vpop.eup %3559  ;;  %v1184_v14 = vsel %vm1183_vm2, %v3558_v9, 0.0 }
 0x33e   : > { %v1139_v12 = vadd.f32 %v3198_v11, %v1111_v6  ;;  %v1009_v13 = vpop.f32.mrb[11].mxu1  ;;  %v3562_v15 = vpop.eup %3561  ;;  %1185 = vadd.xlane.f32.xlu0 %v1184_v14  ;;  %v1187_v45 = vsel %vm1183_vm2, %v3560_v56, 0.0 }
 0x33f   : > { %v1138_v17 = vadd.f32 %v1111_v6, %v1009_v13  ;;  %v1190_v19 = vsel %vm1183_vm2, %v3562_v15, 0.0  ;;  %v3564_v21 = vpop.eup %3563  ;;  %3573 = vtanh.f32 %v1159_v10 }
 0x340   : > { %1191 = vadd.xlane.f32.xlu1 %v1190_v19  ;;  %3575 = vtanh.f32 %v1160_v16  ;;  %v1162_v49 = vadd.f32 %v5006_v7, %v1139_v12  ;;  %v1193_v52 = vsel %vm1183_vm2, %v3564_v21, 0.0 }
 0x341   : > { %v1161_v22 = vadd.f32 %v5006_v7, %v1138_v17  ;;  %v3201_v23 = vpop.f32.mrb[12].mxu1  ;;  %v3566_v48 = vpop.eup %3565 }
 0x342   : > { %v1141_v26 = vadd.f32 %v3201_v23, %v1115_v18  ;;  %v1019_v40 = vpop.f32.mrb[13].mxu1  ;;  %1188 = vadd.xlane.f32.xlu0 %v1187_v45  ;;  %v3568_v54 = vpop.eup %3567  ;;  %v1196_v62 = vsel %vm1183_vm2, %v3566_v48, 0.0 }
 0x343   : > { %v1140_v50 = vadd.f32 %v1115_v18, %v1019_v40  ;;  %3577 = vtanh.f32 %v1161_v22  ;;  %v1199_v4 = vsel %vm1183_vm2, %v3568_v54, 0.0  ;;  %v1249_v54 = vand.u32 127, %v1043_v53 }
 0x344   : > { %1194 = vadd.xlane.f32.xlu1 %v1193_v52  ;;  %3579 = vtanh.f32 %v1162_v49  ;;  %v1164_v2 = vadd.f32 %v5006_v7, %v1141_v26 }
 0x345   : > { %v1163_v57 = vadd.f32 %v5006_v7, %v1140_v50  ;;  %v3204_v58 = vpop.f32.mrb[14].mxu1  ;;  %v3570_v63 = vpop.eup %3569 }
 0x346   : > { %v1143_v59 = vadd.f32 %v3204_v58, %v1119_v51  ;;  %v1029_v61 = vpop.f32.mrb[15].mxu1  ;;  %1197 = vadd.xlane.f32.xlu0 %v1196_v62  ;;  %v3572_v5 = vpop.eup %3571  ;;  %v1202_v8 = vsel %vm1183_vm2, %v3570_v63, 0.0  ;;  %v1254_v58 = vadd.s32 4294967288, %v1249_v54 }
 0x347   : > { %v1142_v3 = vadd.f32 %v1119_v51, %v1029_v61  ;;  %3581 = vtanh.f32 %v1163_v57  ;;  %v1205_v11 = vsel %vm1183_vm2, %v3572_v5, 0.0 }
 0x348   : > { %1200 = vadd.xlane.f32.xlu1 %v1199_v4  ;;  %3583 = vtanh.f32 %v1164_v2  ;;  %v1166_v10 = vadd.f32 %v5006_v7, %v1143_v59  ;;  %v5069_v62 = vsub.s32 %v1254_v58, %v4999_v55  ;;  %v5074_v2 = vsub.s32 %v1249_v54, %v4999_v55 }
 0x349   : > { %v1165_v6 = vadd.f32 %v5006_v7, %v1142_v3  ;;  %v3574_v9 = vpop.eup %3573 }
 0x34a   : > { %1203 = vadd.xlane.f32.xlu0 %v1202_v8  ;;  %v3576_v56 = vpop.eup %3575  ;;  %v1208_v12 = vsel %vm1183_vm2, %v3574_v9, 0.0 }
 0x34b   : > { %3585 = vtanh.f32 %v1165_v6  ;;  %v1211_v14 = vsel %vm1183_vm2, %v3576_v56, 0.0 }
 0x34c   : > { %1206 = vadd.xlane.f32.xlu1 %v1205_v11  ;;  %3587 = vtanh.f32 %v1166_v10 }
 0x34d   : > { %v3578_v13 = vpop.eup %3577 }
 0x34e   : > { %1209 = vadd.xlane.f32.xlu0 %v1208_v12  ;;  %v3580_v15 = vpop.eup %3579  ;;  %v1214_v16 = vsel %vm1183_vm2, %v3578_v13, 0.0 }
 0x34f   : > { %v1217_v7 = vsel %vm1183_vm2, %v3580_v15, 0.0 }
 0x350   : > { %1212 = vadd.xlane.f32.xlu1 %v1211_v14 }
 0x351   : > { %v3582_v17 = vpop.eup %3581 }
 0x352   : > { %1215 = vadd.xlane.f32.xlu0 %v1214_v16  ;;  %v3584_v18 = vpop.eup %3583  ;;  %v1220_v19 = vsel %vm1183_vm2, %v3582_v17, 0.0 }
 0x353   : > { %v1223_v21 = vsel %vm1183_vm2, %v3584_v18, 0.0 }
 0x354   : > { %1218 = vadd.xlane.f32.xlu1 %v1217_v7 }
 0x355   : > { %v3586_v20 = vpop.eup %3585 }
 0x356   : > { %1221 = vadd.xlane.f32.xlu0 %v1220_v19  ;;  %v3588_v22 = vpop.eup %3587  ;;  %v1226_v23 = vsel %vm1183_vm2, %v3586_v20, 0.0 }
 0x357   : > { %v1229_v26 = vsel %vm1183_vm2, %v3588_v22, 0.0 }
 0x358   : > { %1224 = vadd.xlane.f32.xlu1 %v1223_v21 }
 0x35a   : > { %1227 = vadd.xlane.f32.xlu0 %v1226_v23 }
 0x35c   : > { %1230 = vadd.xlane.f32.xlu1 %v1229_v26 }
 0x3cb   : > { %v5047_v40 = vpop.xlane.xlu0 %1185 }
 0x3cc   : > { %v1253_v56 = vrot.slane %v5047_v40, %v5074_v2 }
 0x3cd   : > { %v5049_v45 = vpop.xlane.xlu1 %1191 }
 0x3ce   : > { %v1264_v5 = vrot.slane %v5049_v45, %v5074_v2 }
 0x3cf   : > { %v5051_v48 = vpop.xlane.xlu0 %1188 }
 0x3d0   : > { %v1258_v6 = vrot.slane %v5051_v48, %v5069_v62 }
 0x3d1   : > { %v5053_v49 = vpop.xlane.xlu1 %1194 }
 0x3d2   : > { %v1268_v3 = vrot.slane %v5053_v49, %v5069_v62  ;;  %v1260_v7 = vsel %vm1259_vm3, %v1258_v6, %v1253_v56 }
 0x3d3   : > { %v5055_v50 = vpop.xlane.xlu0 %1197 }
 0x3d4   : > { %v1273_v9 = vrot.slane %v5055_v50, %v5074_v2  ;;  %v1269_v12 = vsel %vm1259_vm3, %v1268_v3, %v1264_v5 }
 0x3d5   : > { %v5057_v51 = vpop.xlane.xlu1 %1200  ;;  %v1325_v21 = vsel %vm1324_vm4, %v1269_v12, %v1260_v7 }
 0x3d6   : > { %v1277_v53 = vrot.slane %v5057_v51, %v5069_v62 }
 0x3d7   : > { %v5059_v52 = vpop.xlane.xlu0 %1203 }
 0x3d8   : > { %v1282_v13 = vrot.slane %v5059_v52, %v5074_v2  ;;  %v1278_v15 = vsel %vm1259_vm3, %v1277_v53, %v1273_v9 }
 0x3d9   : > { %v5062_v57 = vpop.xlane.xlu1 %1206  ;;  %v1327_v54 = vsel %vm1326_vm5, %v1278_v15, %v1325_v21  ;;  %v4308_v15 = vmov 0  }
 0x3da   : > { %v1286_v8 = vrot.slane %v5062_v57, %v5069_v62  ;;  %3556 = vset.pattern.permute.xlu0 %v4308_v15  ;;  %3555 = vset.pattern.permute.xlu1 %v4308_v15 }
 0x3db   : > { %v5064_v59 = vpop.xlane.xlu0 %1209 }
 0x3dc   : > { %v1291_v16 = vrot.slane %v5064_v59, %v5074_v2  ;;  %v1287_v18 = vsel %vm1259_vm3, %v1286_v8, %v1282_v13 }
 0x3dd   : > { %v5066_v61 = vpop.xlane.xlu1 %1212  ;;  %v1329_v3 = vsel %vm1328_vm6, %v1287_v18, %v1327_v54 }
 0x3de   : > { %v1295_v10 = vrot.slane %v5066_v61, %v5069_v62 }
 0x3df   : > { %v5071_v63 = vpop.xlane.xlu0 %1215 }
 0x3e0   : > { %v1300_v19 = vrot.slane %v5071_v63, %v5074_v2  ;;  %v1296_v22 = vsel %vm1259_vm3, %v1295_v10, %v1291_v16  ;;  %v5135_v16 = vsub.s32 1, %v4999_v55 }
 0x3e1   : > { %v5080_v4 = vpop.xlane.xlu1 %1218  ;;  %v1331_v9 = vsel %vm1330_vm7, %v1296_v22, %v1329_v3 }
 0x3e2   : > { %v1304_v14 = vrot.slane %v5080_v4, %v5069_v62 }
 0x3e3   : > { %v5092_v11 = vpop.xlane.xlu0 %1221 }
 0x3e4   : > { %v1309_v23 = vrot.slane %v5092_v11, %v5074_v2  ;;  %v1305_v58 = vsel %vm1259_vm3, %v1304_v14, %v1300_v19 }
 0x3e5   : > { %v5104_v17 = vpop.xlane.xlu1 %1224  ;;  %v1333_v10 = vsel %vm1332_vm8, %v1305_v58, %v1331_v9  ;;  %v5523_v58 = vsub.s32 6, %v4999_v55 }
 0x3e6   : > { %v1313_v20 = vrot.slane %v5104_v17, %v5069_v62 }
 0x3e7   : > { %v5116_v26 = vpop.xlane.xlu0 %1227 }
 0x3e8   : > { %v1314_v5 = vsel %vm1259_vm3, %v1313_v20, %v1309_v23  ;;  %v1318_v6 = vrot.slane %v5116_v26, %v5074_v2  ;;  %v1366_v20 = vsub.s32 5, %v4999_v55  ;;  %v1354_v23 = vsub.s32 2, %v4999_v55 }
 0x3e9   : > { %v5121_v53 = vpop.xlane.xlu1 %1230  ;;  %v1335_v12 = vsel %vm1334_vm9, %v1314_v5, %v1333_v10 }
 0x3ea   : > { %v1322_v8 = vrot.slane %v5121_v53, %v5069_v62 }
 0x3ec   : > { %v1323_v56 = vsel %vm1259_vm3, %v1322_v8, %v1318_v6 }
 0x3ed   : > { %v1337_v13 = vsel %vm1336_vm10, %v1323_v56, %v1335_v12  ;;  %v1358_v56 = vsub.s32 3, %v4999_v55 }
 0x3ee   : > { %v1340_v14 = vsel %vm1339_vm11, %v1337_v13, -inf }
 0x3ef   : > { %1341 = vmax.xlane.f32.xlu0 %v1340_v14 }
 0x47c   : > { %v1342_v7 = vpop.xlane.xlu0 %1341 }
 0x47d   : > { %v1347_v18 = vrot.slane %v1342_v7, %v5003_v60  ;;  %v1351_v19 = vrot.slane %v1342_v7, %v5135_v16  ;;  %v5147_v3 = vrot.slane %v1342_v7, %v1366_v20  ;;  %v1355_v8 = vrot.slane %v1342_v7, %v1354_v23 }
 0x47f   : > { %v1384_v21 = vsub.f32 %v5047_v40, %v1347_v18  ;;  %v1385_v22 = vsub.f32 %v5051_v48, %v1347_v18  ;;  %v1386_v54 = vsub.f32 %v5049_v45, %v1351_v19  ;;  %v1387_v9 = vsub.f32 %v5053_v49, %v1351_v19 }
 0x480   : > { %v1374_v48 = vsub.s32 7, %v4999_v55  ;;  %v5155_v45 = vrot.slane %v1342_v7, %v5523_v58  ;;  %v1394_v10 = vsub.f32 %v5071_v63, %v5147_v3  ;;  %v1388_v12 = vsub.f32 %v5055_v50, %v1355_v8 }
 0x481   : > { %v1400_v5 = vmul.f32 1.442695, %v1384_v21  ;;  %v1402_v6 = vmul.f32 1.442695, %v1385_v22  ;;  %v1404_v40 = vmul.f32 1.442695, %v1386_v54  ;;  %v1359_v18 = vrot.slane %v1342_v7, %v1358_v56 }
 0x482   : > { %v1406_v13 = vmul.f32 1.442695, %v1387_v9  ;;  %v1375_v49 = vrot.slane %v1342_v7, %v1374_v48  ;;  %v1396_v14 = vsub.f32 %v5092_v11, %v5155_v45  ;;  %v1420_v15 = vmul.f32 1.442695, %v1394_v10 }
 0x483   : > { %3589 = vpow2.f32 %v1400_v5  ;;  %v1389_v19 = vsub.f32 %v5057_v51, %v1355_v8  ;;  %v1408_v63 = vmul.f32 1.442695, %v1388_v12  ;;  %v1362_v11 = vsub.s32 4, %v4999_v55 }
 0x484   : > { %3591 = vpow2.f32 %v1402_v6  ;;  %v1398_v50 = vsub.f32 %v5116_v26, %v1375_v49  ;;  %v1424_v22 = vmul.f32 1.442695, %v1396_v14  ;;  %v1390_v5 = vsub.f32 %v5059_v52, %v1359_v18 }
 0x485   : > { %3593 = vpow2.f32 %v1404_v40  ;;  %v1410_v6 = vmul.f32 1.442695, %v1389_v19  ;;  %v1363_v26 = vrot.slane %v1342_v7, %v1362_v11  ;;  %v1391_v9 = vsub.f32 %v5062_v57, %v1359_v18 }
 0x486   : > { %3595 = vpow2.f32 %v1406_v13  ;;  %v1428_v8 = vmul.f32 1.442695, %v1398_v50  ;;  %v1412_v40 = vmul.f32 1.442695, %v1390_v5  ;;  %v1395_v19 = vsub.f32 %v5080_v4, %v5147_v3 }
 0x487   : > { %3597 = vpow2.f32 %v1420_v15  ;;  %v1392_v12 = vsub.f32 %v5064_v59, %v1363_v26  ;;  %v1414_v13 = vmul.f32 1.442695, %v1391_v9  ;;  %v1393_v7 = vsub.f32 %v5066_v61, %v1363_v26 }
 0x488   : > { %3599 = vpow2.f32 %v1408_v63  ;;  %v1397_v61 = vsub.f32 %v5104_v17, %v5155_v45 }
 0x489   : > { %3601 = vpow2.f32 %v1424_v22  ;;  %v1416_v15 = vmul.f32 1.442695, %v1392_v12  ;;  %v1418_v63 = vmul.f32 1.442695, %v1393_v7  ;;  %v1422_v22 = vmul.f32 1.442695, %v1395_v19 }
 0x48a   : > { %3603 = vpow2.f32 %v1410_v6  ;;  %v1399_v6 = vsub.f32 %v5121_v53, %v1375_v49  ;;  %v1426_v4 = vmul.f32 1.442695, %v1397_v61 }
 0x48b   : > { %3605 = vpow2.f32 %v1428_v8 }
 0x48c   : > { %3607 = vpow2.f32 %v1412_v40  ;;  %v1430_v8 = vmul.f32 1.442695, %v1399_v6 }
 0x48d   : > { %v5168_v21 = vpop.eup %3589  ;;  %3609 = vpow2.f32 %v1414_v13 }
 0x48e   : > { %v5171_v54 = vpop.eup %3591  ;;  %1449 = vperm.xlu1 %3555, %v5168_v21   ;;  %3611 = vpow2.f32 %v1416_v15 }
 0x48f   : > { %1452 = vperm.xlu0 %3556, %v5171_v54   ;;  %v5177_v51 = vpop.eup %3593  ;;  %3613 = vpow2.f32 %v1418_v63 }
 0x490   : > { %v5183_v10 = vpop.eup %3595  ;;  %3615 = vpow2.f32 %v1422_v22 }
 0x491   : > { %v5186_v52 = vpop.eup %3597  ;;  %3617 = vpow2.f32 %v1426_v4 }
 0x492   : > { %1455 = vperm.xlu1 %3555, %v5177_v51   ;;  %v5190_v14 = vpop.eup %3599  ;;  %3619 = vpow2.f32 %v1430_v8 }
 0x493   : > { %1479 = vperm.xlu0 %3556, %v5186_v52   ;;  %v5193_v57 = vpop.eup %3601 }
 0x494   : > { %v5197_v18 = vpop.eup %3603 }
 0x495   : > { %v5200_v59 = vpop.eup %3605 }
 0x496   : > { %1458 = vperm.xlu1 %3555, %v5183_v10   ;;  %v5205_v50 = vpop.eup %3607 }
 0x497   : > { %1485 = vperm.xlu0 %3556, %v5193_v57   ;;  %v5210_v5 = vpop.eup %3609 }
 0x498   : > { %v5214_v3 = vpop.eup %3611 }
 0x499   : > { %v5217_v26 = vpop.eup %3613 }
 0x49a   : > { %1461 = vperm.xlu1 %3555, %v5190_v14   ;;  %v5220_v17 = vpop.eup %3615 }
 0x49b   : > { %1491 = vperm.xlu0 %3556, %v5200_v59   ;;  %v5223_v45 = vpop.eup %3617 }
 0x49c   : > { %v5226_v53 = vpop.eup %3619 }
 0x49e   : > { %1464 = vperm.xlu1 %3555, %v5197_v18  }
 0x4a2   : > { %1467 = vperm.xlu1 %3555, %v5205_v50  }
 0x4a6   : > { %1470 = vperm.xlu1 %3555, %v5210_v5  }
 0x4aa   : > { %1473 = vperm.xlu1 %3555, %v5214_v3  }
 0x4ae   : > { %1476 = vperm.xlu1 %3555, %v5217_v26  }
 0x4b2   : > { %1482 = vperm.xlu1 %3555, %v5220_v17  }
 0x4b6   : > { %1488 = vperm.xlu1 %3555, %v5223_v45  }
 0x4ba   : > { %1494 = vperm.xlu1 %3555, %v5226_v53  }
 0x50d   : > { %v1450_v49 = vpop.permute.xlu1 %1449 }
 0x50e   : > { %v1453_v15 = vpop.permute.xlu0 %1452  ;;  %v1499_v41 = vrot.slane %v1450_v49, %v5074_v2 }
 0x50f   : > { %v1503_v46 = vrot.slane %v1453_v15, %v5069_v62 }
 0x511   : > { %v1456_v9 = vpop.permute.xlu1 %1455  ;;  %v1504_v49 = vsel %vm1259_vm3, %v1503_v46, %v1499_v41 }
 0x512   : > { %v1480_v61 = vpop.permute.xlu0 %1479  ;;  %v1508_v36 = vrot.slane %v1456_v9, %v5074_v2 }
 0x513   : > { %v1544_v9 = vrot.slane %v1480_v61, %v5074_v2 }
 0x515   : > { %v1459_v40 = vpop.permute.xlu1 %1458 }
 0x516   : > { %v1512_v6 = vrot.slane %v1459_v40, %v5069_v62  ;;  %v1486_v4 = vpop.permute.xlu0 %1485 }
 0x518   : > { %v1513_v1 = vsel %vm1259_vm3, %v1512_v6, %v1508_v36 }
 0x519   : > { %v1462_v12 = vpop.permute.xlu1 %1461  ;;  %v1568_v36 = vsel %vm1324_vm4, %v1513_v1, %v1504_v49 }
 0x51a   : > { %v1517_v31 = vrot.slane %v1462_v12, %v5074_v2 }
 0x51d   : > { %v1465_v13 = vpop.permute.xlu1 %1464 }
 0x51e   : > { %v1521_v8 = vrot.slane %v1465_v13, %v5069_v62 }
 0x520   : > { %v1522_v13 = vsel %vm1259_vm3, %v1521_v8, %v1517_v31 }
 0x521   : > { %v1468_v7 = vpop.permute.xlu1 %1467  ;;  %v1569_v31 = vsel %vm1326_vm5, %v1522_v13, %v1568_v36 }
 0x522   : > { %v1526_v40 = vrot.slane %v1468_v7, %v5074_v2  ;;  %v1492_v7 = vpop.permute.xlu0 %1491 }
 0x525   : > { %v1471_v19 = vpop.permute.xlu1 %1470 }
 0x526   : > { %v1530_v35 = vrot.slane %v1471_v19, %v5069_v62 }
 0x528   : > { %v1531_v19 = vsel %vm1259_vm3, %v1530_v35, %v1526_v40  ;;  %v1562_v35 = vrot.slane %v1492_v7, %v5074_v2 }
 0x529   : > { %v1474_v63 = vpop.permute.xlu1 %1473  ;;  %v1570_v6 = vsel %vm1328_vm6, %v1531_v19, %v1569_v31 }
 0x52a   : > { %v1535_v15 = vrot.slane %v1474_v63, %v5074_v2 }
 0x52d   : > { %v1477_v22 = vpop.permute.xlu1 %1476 }
 0x52e   : > { %v1539_v0 = vrot.slane %v1477_v22, %v5069_v62  ;;  %v1553_v22 = vrot.slane %v1486_v4, %v5074_v2 }
 0x531   : > { %v1483_v47 = vpop.permute.xlu1 %1482 }
 0x532   : > { %v1548_v27 = vrot.slane %v1483_v47, %v5069_v62  ;;  %v1540_v47 = vsel %vm1259_vm3, %v1539_v0, %v1535_v15 }
 0x534   : > { %v1549_v63 = vsel %vm1259_vm3, %v1548_v27, %v1544_v9 }
 0x535   : > { %v1489_v58 = vpop.permute.xlu1 %1488 }
 0x536   : > { %v1557_v12 = vrot.slane %v1489_v58, %v5069_v62  ;;  %v1571_v58 = vsel %vm1330_vm7, %v1540_v47, %v1570_v6 }
 0x537   : > { %v1572_v1 = vsel %vm1332_vm8, %v1549_v63, %v1571_v58 }
 0x538   : > { %v1558_v41 = vsel %vm1259_vm3, %v1557_v12, %v1553_v22 }
 0x539   : > { %v1495_v46 = vpop.permute.xlu1 %1494  ;;  %v1573_v0 = vsel %vm1334_vm9, %v1558_v41, %v1572_v1  ;;  %v5584_v1 = vpack.c.bf16 %v4927_v29, %v4925_v28 }
 0x53a   : > { %v1566_v61 = vrot.slane %v1495_v46, %v5069_v62 }
 0x53c   : > { %v1567_v4 = vsel %vm1259_vm3, %v1566_v61, %v1562_v35 }
 0x53d   : > { %v1574_v8 = vsel %vm1336_vm10, %v1567_v4, %v1573_v0 }
 0x53e   : > { %v1576_v27 = vsel %vm1339_vm11, %v1574_v8, 0.0 }
 0x53f   : > { %1577 = vadd.xlane.f32.xlu0 %v1576_v27  ;;  %v5585_v27 = vpack.c.bf16 %v4934_v32, %v4929_v30  ;;  %v5586_v32 = vpack.c.bf16 %v4938_v34, %v4936_v33 }
 0x5cc   : > { %v1578_v40 = vpop.xlane.xlu0 %1577 }
 0x5cd   : > { %3621 = vrcp.f32 %v1578_v40 }
 0x5d7   : > { %v3622_v13 = vpop.eup %3621 }
 0x5d8   : > { %v1600_v15 = vrot.slane %v3622_v13, %v1362_v11  ;;  %v1584_v49 = vrot.slane %v3622_v13, %v5003_v60  ;;  %v1612_v12 = vrot.slane %v3622_v13, %v1374_v48  ;;  %v1588_v7 = vrot.slane %v3622_v13, %v5135_v16 }
 0x5da   : > { %v1629_v9 = vmul.f32 %v5214_v3, %v1600_v15  ;;  %v1621_v19 = vmul.f32 %v5168_v21, %v1584_v49  ;;  %v1635_v22 = vmul.f32 %v5200_v59, %v1612_v12  ;;  %v1622_v36 = vmul.f32 %v5171_v54, %v1584_v49 }
 0x5db   : > { %v1623_v11 = vmul.f32 %v5177_v51, %v1588_v7  ;;  %v1624_v3 = vmul.f32 %v5183_v10, %v1588_v7  ;;  %v1592_v21 = vrot.slane %v3622_v13, %v1354_v23  ;;  %v1596_v54 = vrot.slane %v3622_v13, %v1358_v56 }
 0x5dc   : > { %1996 = vperm.xlu0 %3556, %v1629_v9   ;;  %1640 = vperm.xlu1 %3555, %v1621_v19   ;;  %v1630_v10 = vmul.f32 %v5217_v26, %v1600_v15  ;;  %v1604_v23 = vrot.slane %v3622_v13, %v1366_v20  ;;  %v5580_v56 = vsub.s32 6, %v4999_v55  ;;  %v1636_v26 = vmul.f32 %v5226_v53, %v1612_v12 }
 0x5dd   : > { %v1625_v48 = vmul.f32 %v5190_v14, %v1592_v21  ;;  %v1626_v59 = vmul.f32 %v5197_v18, %v1592_v21  ;;  %v1627_v47 = vmul.f32 %v5205_v50, %v1596_v54  ;;  %v1628_v51 = vmul.f32 %v5210_v5, %v1596_v54 }
 0x5de   : > { %v1631_v14 = vmul.f32 %v5186_v52, %v1604_v23  ;;  %v1632_v18 = vmul.f32 %v5220_v17, %v1604_v23  ;;  %v1608_v31 = vrot.slane %v3622_v13, %v5580_v56  ;;  %v5583_v53 = vmov 0.0|0.0   ;;  %v2378_v23 = vld [vmem:[#allocation16 + $0x18] sm:$0xff]  ;;  %v2380_v56 = vld [vmem:[#allocation16 + $0x28] sm:$0xff] }
 0x5e0   : > { %2263 = vperm.xlu0 %3556, %v1635_v22   ;;  %1643 = vperm.xlu1 %3555, %v1622_v36   ;;  %v1633_v50 = vmul.f32 %v5193_v57, %v1608_v31  ;;  %v1634_v5 = vmul.f32 %v5223_v45, %v1608_v31  ;;  %v5581_v57 = vpack.c.bf16 %v4921_v25, %v4919_v24  ;;  %v5582_v45 = vmov 0.0   ;;  %v2382_v31 = vld [vmem:[#allocation16 + $0x38] sm:$0xff] }
 0x5e1   : > { %v5587_v22 = vpack.c.bf16 %v4946_v38, %v4944_v37 }
 0x5e4   : > { %1729 = vperm.xlu1 %3555, %v1623_v11  }
 0x5e8   : > { %1732 = vperm.xlu1 %3555, %v1624_v3   ;;  %v5588_v3 = vpack.c.bf16 %v4952_v42, %v4948_v39  ;;  %v5589_v39 = vpack.c.bf16 %v4956_v44, %v4954_v43  ;;  %v3317_v44 = vpack.c.bf16 %v2382_v31, %v2380_v56 }
 0x5ec   : > { %1818 = vperm.xlu1 %3555, %v1625_v48  }
 0x5f0   : > { %1821 = vperm.xlu1 %3555, %v1626_v59  }
 0x5f4   : > { %1907 = vperm.xlu1 %3555, %v1627_v47  }
 0x5f8   : > { %1910 = vperm.xlu1 %3555, %v1628_v51  }
 0x5fc   : > { %1999 = vperm.xlu1 %3555, %v1630_v10   ;;  %v2376_v10 = vld [vmem:[#allocation16 + $0x8] sm:$0xff] }
 0x600   : > { %2085 = vperm.xlu1 %3555, %v1631_v14   ;;  %v2375_v14 = vld [vmem:[#allocation16] sm:$0xff] }
 0x604   : > { %2088 = vperm.xlu1 %3555, %v1632_v18   ;;  %v3313_v18 = vpack.c.bf16 %v2378_v23, %v2376_v10 }
 0x606   : > { %3314 = vmatprep.subr.bf16.mxu1 %v3313_v18 }
 0x608   : > { %2174 = vperm.xlu1 %3555, %v1633_v50   ;;  %v2379_v50 = vld [vmem:[#allocation16 + $0x20] sm:$0xff] }
 0x60c   : > { %2177 = vperm.xlu1 %3555, %v1634_v5   ;;  %v2384_v5 = vld [vmem:[#allocation16 + $0x48] sm:$0xff] }
 0x610   : > { %2266 = vperm.xlu1 %3555, %v1636_v26   ;;  %v2386_v26 = vld [vmem:[#allocation16 + $0x58] sm:$0xff] }
 0x65b   : > { %v1641_v20 = vpop.permute.xlu1 %1640  ;;  %v1997_v13 = vpop.permute.xlu0 %1996 }
 0x65c   : > { %v1648_v52 = vrot.slane %v1641_v20, %v5074_v2  ;;  %v2004_v9 = vrot.slane %v1997_v13, %v5074_v2  ;;  %v2497_v13 = vld [vmem:[#allocation19 + $0x58] sm:$0xff] }
 0x65f   : > { %v1644_v63 = vpop.permute.xlu1 %1643  ;;  %v2264_v48 = vpop.permute.xlu0 %2263 }
 0x660   : > { %v1652_v6 = vrot.slane %v1644_v63, %v5069_v62  ;;  %v2271_v47 = vrot.slane %v2264_v48, %v5074_v2  ;;  %v2383_v63 = vld [vmem:[#allocation16 + $0x40] sm:$0xff] }
 0x662   : > { %v1653_v17 = vsel %vm1259_vm3, %v1652_v6, %v1648_v52  ;;  %v2385_v52 = vld [vmem:[#allocation16 + $0x50] sm:$0xff] }
 0x663   : > { %3210 = vmatmul.mubr.msk.f32.vlgmr.msra.gmra.mrb[2].mxu0 %vm1339_vm11, %v1653_v17  ;;  %v1730_v55 = vpop.permute.xlu1 %1729  ;;  %v2487_v6 = vld [vmem:[#allocation19 + $0x8] sm:$0xff]  ;;  %v3321_v17 = vpack.c.bf16 %v2386_v26, %v2384_v5 }
 0x664   : > { %3294 = vmatpush3.bf16.msra.mxu0 %v5581_v57  ;;  %3216 = vmatprep.mubr.msk.f32.mxu0 %vm4305_vm0, %v5582_v45  ;;  %v1737_v46 = vrot.slane %v1730_v55, %v5074_v2  ;;  %v2388_v55 = vld [vmem:[#allocation16 + $0x68] sm:$0xff]  ;;  %v2390_v57 = vld [vmem:[#allocation16 + $0x78] sm:$0xff] }
 0x665   : > { %3295 = vmatprep.subr.bf16.mxu0 %v5583_v53 }
 0x667   : > { %v1733_v41 = vpop.permute.xlu1 %1732 }
 0x668   : > { %v1741_v35 = vrot.slane %v1733_v41, %v5069_v62  ;;  %v2486_v41 = vld [vmem:[#allocation19] sm:$0xff] }
 0x66a   : > { %v1742_v58 = vsel %vm1259_vm3, %v1741_v35, %v1737_v46  ;;  %v2488_v46 = vld [vmem:[#allocation19 + $0x10] sm:$0xff]  ;;  %v2491_v35 = vld [vmem:[#allocation19 + $0x28] sm:$0xff] }
 0x66b   : > { %3217 = vmatmul.mubr.msk.f32.vlgmr.msra.gmra.mrb[4].mxu0 %vm1339_vm11, %v1742_v58  ;;  %v1819_v61 = vpop.permute.xlu1 %1818  ;;  %v3339_v58 = vpack.c.bf16 %v2488_v46, %v2486_v41 }
 0x66c   : > { %3297 = vmatpush3.bf16.msra.mxu0 %v5584_v1  ;;  %3223 = vmatprep.mubr.msk.f32.mxu0 %vm4305_vm0, %v5582_v45  ;;  %v1826_v25 = vrot.slane %v1819_v61, %v5074_v2  ;;  %v2493_v61 = vld [vmem:[#allocation19 + $0x38] sm:$0xff]  ;;  %v2490_v1 = vld [vmem:[#allocation19 + $0x20] sm:$0xff] }
 0x66d   : > { %3298 = vmatprep.subr.bf16.mxu0 %v5583_v53 }
 0x66f   : > { %v1822_v24 = vpop.permute.xlu1 %1821 }
 0x670   : > { %v1830_v4 = vrot.slane %v1822_v24, %v5069_v62  ;;  %v2492_v24 = vld [vmem:[#allocation19 + $0x30] sm:$0xff] }
 0x672   : > { %v1831_v0 = vsel %vm1259_vm3, %v1830_v4, %v1826_v25  ;;  %v3323_v25 = vpack.c.bf16 %v2385_v52, %v2383_v63  ;;  %v2387_v4 = vld [vmem:[#allocation16 + $0x60] sm:$0xff] }
 0x673   : > { %3224 = vmatmul.mubr.msk.f32.vlgmr.msra.gmra.mrb[6].mxu0 %vm1339_vm11, %v1831_v0  ;;  %v1908_v8 = vpop.permute.xlu1 %1907  ;;  %v2389_v0 = vld [vmem:[#allocation16 + $0x70] sm:$0xff] }
 0x674   : > { %3300 = vmatpush3.bf16.msra.mxu0 %v5585_v27  ;;  %3230 = vmatprep.mubr.msk.f32.mxu0 %vm4305_vm0, %v5582_v45  ;;  %v1915_v29 = vrot.slane %v1908_v8, %v5074_v2  ;;  %v3341_v8 = vpack.c.bf16 %v2493_v61, %v2491_v35  ;;  %v3325_v27 = vpack.c.bf16 %v2390_v57, %v2388_v55 }
 0x675   : > { %3301 = vmatprep.subr.bf16.mxu0 %v5583_v53 }
 0x677   : > { %v1911_v28 = vpop.permute.xlu1 %1910 }
 0x678   : > { %v1919_v40 = vrot.slane %v1911_v28, %v5069_v62  ;;  %v3343_v28 = vpack.c.bf16 %v2492_v24, %v2490_v1 }
 0x67a   : > { %v1920_v15 = vsel %vm1259_vm3, %v1919_v40, %v1915_v29  ;;  %v2392_v29 = vld [vmem:[#allocation16 + $0x88] sm:$0xff] }
 0x67b   : > { %3231 = vmatmul.mubr.msk.f32.vlgmr.msra.gmra.mrb[8].mxu0 %vm1339_vm11, %v1920_v15  ;;  %v2000_v49 = vpop.permute.xlu1 %1999  ;;  %v2495_v40 = vld [vmem:[#allocation19 + $0x48] sm:$0xff]  ;;  %v2394_v15 = vld [vmem:[#allocation16 + $0x98] sm:$0xff] }
 0x67c   : > { %v2008_v30 = vrot.slane %v2000_v49, %v5069_v62  ;;  %3303 = vmatpush3.bf16.msra.mxu0 %v5586_v32  ;;  %3237 = vmatprep.mubr.msk.f32.mxu0 %vm4305_vm0, %v5582_v45  ;;  %v3345_v49 = vpack.c.bf16 %v2497_v13, %v2495_v40  ;;  %v3327_v32 = vpack.c.bf16 %v2389_v0, %v2387_v4 }
 0x67d   : > { %3304 = vmatprep.subr.bf16.mxu0 %v5583_v53 }
 0x67e   : > { %v2009_v19 = vsel %vm1259_vm3, %v2008_v30, %v2004_v9  ;;  %v2494_v9 = vld [vmem:[#allocation19 + $0x40] sm:$0xff]  ;;  %v2496_v30 = vld [vmem:[#allocation19 + $0x50] sm:$0xff] }
 0x67f   : > { %3238 = vmatmul.mubr.msk.f32.vlgmr.msra.gmra.mrb[10].mxu0 %vm1339_vm11, %v2009_v19  ;;  %v2086_v12 = vpop.permute.xlu1 %2085  ;;  %v2499_v19 = vld [vmem:[#allocation19 + $0x68] sm:$0xff] }
 0x680   : > { %3306 = vmatpush3.bf16.msra.mxu0 %v5587_v22  ;;  %3244 = vmatprep.mubr.msk.f32.mxu0 %vm4305_vm0, %v5582_v45  ;;  %v2093_v34 = vrot.slane %v2086_v12, %v5074_v2  ;;  %v2501_v12 = vld [vmem:[#allocation19 + $0x78] sm:$0xff]  ;;  %v3329_v22 = vpack.c.bf16 %v2394_v15, %v2392_v29 }
 0x681   : > { %3307 = vmatprep.subr.bf16.mxu0 %v5583_v53  ;;  %v2399_v29 = vld [vmem:[#allocation18] sm:$0x3] }
 0x682   : > { %v2404_v13 = vrot.slane %v2399_v29, %v5003_v60 }
 0x683   : > { %v2089_v33 = vpop.permute.xlu1 %2088 }
 0x684   : > { %v2097_v36 = vrot.slane %v2089_v33, %v5069_v62  ;;  %v2391_v33 = vld [vmem:[#allocation16 + $0x80] sm:$0xff] }
 0x686   : > { %v2098_v7 = vsel %vm1259_vm3, %v2097_v36, %v2093_v34  ;;  %v2393_v34 = vld [vmem:[#allocation16 + $0x90] sm:$0xff]  ;;  %v3347_v36 = vpack.c.bf16 %v2496_v30, %v2494_v9 }
 0x687   : > { %3245 = vmatmul.mubr.msk.f32.vlgmr.msra.gmra.mrb[12].mxu0 %vm1339_vm11, %v2098_v7  ;;  %v2175_v11 = vpop.permute.xlu1 %2174  ;;  %v2396_v7 = vld [vmem:[#allocation16 + $0xa8] sm:$0xff] }
 0x688   : > { %3309 = vmatpush3.bf16.msra.mxu0 %v5588_v3  ;;  %3251 = vmatprep.mubr.msk.f32.mxu0 %vm4305_vm0, %v5582_v45  ;;  %v2182_v38 = vrot.slane %v2175_v11, %v5074_v2  ;;  %v2377_v2 = vld [vmem:[#allocation16 + $0x10] sm:$0xff]  ;;  %v2398_v11 = vld [vmem:[#allocation16 + $0xb8] sm:$0xff]  ;;  %v3349_v3 = vpack.c.bf16 %v2501_v12, %v2499_v19 }
 0x689   : > { %3310 = vmatprep.subr.bf16.mxu0 %v5583_v53  ;;  %v3315_v43 = vpack.c.bf16 %v2377_v2, %v2375_v14  ;;  %v3333_v48 = vpack.c.bf16 %v2398_v11, %v2396_v7 }
 0x68b   : > { %v2178_v37 = vpop.permute.xlu1 %2177  ;;  %3316 = vmatpush1.bf16.msra.mxu1 %v3315_v43 }
 0x68c   : > { %v2186_v21 = vrot.slane %v2178_v37, %v5069_v62  ;;  %3318 = vmatprep.subr.bf16.mxu1 %v3317_v44  ;;  %v2498_v37 = vld [vmem:[#allocation19 + $0x60] sm:$0xff] }
 0x68e   : > { %v2187_v59 = vsel %vm1259_vm3, %v2186_v21, %v2182_v38  ;;  %v2500_v38 = vld [vmem:[#allocation19 + $0x70] sm:$0xff]  ;;  %v3331_v21 = vpack.c.bf16 %v2393_v34, %v2391_v33  ;;  %v2408_v34 = vrot.slane %v2399_v29, %v5135_v16 }
 0x68f   : > { %3252 = vmatmul.mubr.msk.f32.vlgmr.msra.gmra.mrb[14].mxu0 %vm1339_vm11, %v2187_v59  ;;  %v2267_v54 = vpop.permute.xlu1 %2266  ;;  %v2395_v59 = vld [vmem:[#allocation16 + $0xa0] sm:$0xff] }
 0x690   : > { %3312 = vmatpush3.bf16.msra.mxu0 %v5589_v39  ;;  %v2275_v42 = vrot.slane %v2267_v54, %v5069_v62  ;;  %3258 = vmatprep.mubr.msk.f32.mxu0 %vm4305_vm0, %v5582_v45  ;;  %v2381_v62 = vld [vmem:[#allocation16 + $0x30] sm:$0xff] }
 0x691   : > { %v3319_v20 = vpack.c.bf16 %v2381_v62, %v2379_v50  ;;  %v2397_v54 = vld [vmem:[#allocation16 + $0xb0] sm:$0xff] }
 0x692   : > { %v2276_v51 = vsel %vm1259_vm3, %v2275_v42, %v2271_v47  ;;  %v3351_v47 = vpack.c.bf16 %v2500_v38, %v2498_v37  ;;  %v3335_v39 = vpack.c.bf16 %v2397_v54, %v2395_v59  ;;  %v3629_v42 = vld [vmem:[#allocation7] sm:$0xff] }
 0x693   : > { %3259 = vmatmul.mubr.msk.f32.vlgmr.msra.gmra.mrb[16].mxu0 %vm1339_vm11, %v2276_v51  ;;  %3320 = vmatpush1.bf16.msra.mxu1 %v3319_v20 }
 0x694   : > { %2578 = vmatprep.mubr.f32.mxu0 %v5582_v45  ;;  %v2489_v45 = vld [vmem:[#allocation19 + $0x18] sm:$0xff]  ;;  %3322 = vmatprep.subr.bf16.mxu1 %v3321_v17 }
 0x695   : > { %v3337_v53 = vpack.c.bf16 %v2489_v45, %v2487_v6  ;;  %v737_v45 = vld [vmem:[#allocation2] sm:$0xff] }
 0x696   : > { %2616 = vst.msk [vmem:[#allocation3 + $0x8] sm:$0xff] %vm1183_vm2, %v737_v45 }
 0x697   : > { %3338 = vmatprep.subr.bf16.mxu0 %v3337_v53  ;;  %3324 = vmatpush1.bf16.msra.mxu1 %v3323_v25 }
 0x698   : > { %3340 = vmatpush1.bf16.msra.mxu0 %v3339_v58  ;;  %3326 = vmatprep.subr.bf16.mxu1 %v3325_v27 }
 0x699   : > { %3342 = vmatprep.subr.bf16.mxu0 %v3341_v8 }
 0x69b   : > { %3328 = vmatpush1.bf16.msra.mxu1 %v3327_v32 }
 0x69c   : > { %3344 = vmatpush1.bf16.msra.mxu0 %v3343_v28  ;;  %3330 = vmatprep.subr.bf16.mxu1 %v3329_v22  ;;  %v2502_v28 = vld [vmem:[#allocation21] sm:$0x3] }
 0x69d   : > { %3346 = vmatprep.subr.bf16.mxu0 %v3345_v49  ;;  %v2507_v40 = vrot.slane %v2502_v28, %v5003_v60  ;;  %v2511_v33 = vrot.slane %v2502_v28, %v5135_v16 }
 0x69f   : > { %3332 = vmatpush1.bf16.msra.mxu1 %v3331_v21 }
 0x6a0   : > { %3348 = vmatpush1.bf16.msra.mxu0 %v3347_v36  ;;  %3334 = vmatprep.subr.bf16.mxu1 %v3333_v48 }
 0x6a1   : > { %3350 = vmatprep.subr.bf16.mxu0 %v3349_v3 }
 0x6a3   : > { %3336 = vmatpush1.bf16.msra.mxu1 %v3335_v39 }
 0x6a4   : > { %3352 = vmatpush1.bf16.msra.mxu0 %v3351_v47 }
 0x6a7   : > { %3071 = vmatmul.mubr.msk.f32.vlgmr.msra.gmra.mrb[18].mxu0 %vm763_vm1, %v3629_v42 }
 0x736   : > { %v1722_v51 = vpop.f32.mrb[2].mxu0 }
 0x737   : > { %v3211_v10 = vpop.f32.mrb[3].mxu0 }
 0x73e   : > { %v1811_v23 = vpop.f32.mrb[4].mxu0 }
 0x73f   : > { %v2357_v14 = vrot.slane %v1811_v23, 7  ;;  %v3218_v18 = vpop.f32.mrb[5].mxu0 }
 0x741   : > { %v2358_v2 = vsel %vm1324_vm4, %v2357_v14, %v1722_v51 }
 0x746   : > { %v1900_v56 = vpop.f32.mrb[6].mxu0 }
 0x747   : > { %v2359_v31 = vrot.slane %v1900_v56, 6  ;;  %v3225_v43 = vpop.f32.mrb[7].mxu0 }
 0x749   : > { %v2360_v44 = vsel %vm1326_vm5, %v2359_v31, %v2358_v2 }
 0x74e   : > { %v1989_v50 = vpop.f32.mrb[8].mxu0 }
 0x74f   : > { %v2361_v62 = vrot.slane %v1989_v50, 5  ;;  %v3232_v5 = vpop.f32.mrb[9].mxu0 }
 0x751   : > { %v2362_v26 = vsel %vm1328_vm6, %v2361_v62, %v2360_v44 }
 0x752   : > { %v2078_v20 = vpop.f32.mrb[10].mxu0 }
 0x753   : > { %v2363_v63 = vrot.slane %v2078_v20, 4  ;;  %v3239_v52 = vpop.f32.mrb[11].mxu0 }
 0x755   : > { %v2364_v6 = vsel %vm1330_vm7, %v2363_v63, %v2362_v26 }
 0x75a   : > { %v2167_v17 = vpop.f32.mrb[12].mxu0 }
 0x75b   : > { %v2365_v55 = vrot.slane %v2167_v17, 3  ;;  %v3246_v57 = vpop.f32.mrb[13].mxu0 }
 0x75d   : > { %v2366_v53 = vsel %vm1332_vm8, %v2365_v55, %v2364_v6 }
 0x762   : > { %v2256_v41 = vpop.f32.mrb[14].mxu0 }
 0x763   : > { %v2367_v46 = vrot.slane %v2256_v41, 2  ;;  %v3253_v35 = vpop.f32.mrb[15].mxu0 }
 0x765   : > { %v2368_v58 = vsel %vm1334_vm9, %v2367_v46, %v2366_v53 }
 0x766   : > { %v2345_v61 = vpop.f32.mrb[16].mxu0 }
 0x767   : > { %v2369_v1 = vrot.slane %v2345_v61, 1  ;;  %v3260_v24 = vpop.f32.mrb[17].mxu0 }
 0x769   : > { %v2370_v25 = vsel %vm1336_vm10, %v2369_v1, %v2368_v58 }
 0x76a   : > { %2371 = vrot.lane.b32.xlu0 %v2370_v25, %s4309_s4 }
 0x76e   : > { %2601 = vrot.lane.b32.xlu0 %v3629_v42, %s4310_s15 }
 0x772   : > { %2611 = vrot.lane.b32.xlu0 %v2370_v25, %s4310_s15 }
 0x77a   : > { %v2580_v8 = vpop.f32.mrb[18].mxu0 }
 0x77b   : > { %v2582_v27 = vpop.f32.mrb[19].mxu0  ;;  %v2581_v15 = vadd.f32 %v2580_v8, %v2507_v40 }
 0x77c   : > { %v2583_v36 = vadd.f32 %v2582_v27, %v2511_v33 }
 0x7dc   : > { %v2372_v4 = vpop.permute.xlu0 %2371 }
 0x7dd   : > { %v2374_v0 = vsel %vm1183_vm2, %v737_v45, %v2372_v4 }
 0x7de   : > { %3070 = vmatmul.mubr.msk.f32.vlgmr.msra.gmra.mrb[16].mxu1 %vm2411_vm12, %v2374_v0 }
 0x7e0   : > { %v2602_v21 = vpop.permute.xlu0 %2601 }
 0x7e4   : > { %v2612_v39 = vpop.permute.xlu0 %2611 }
 0x8b1   : > { %v2481_v49 = vpop.f32.mrb[16].mxu1 }
 0x8b2   : > { %v2482_v9 = vadd.f32 %v2481_v49, %v2404_v13  ;;  %v2483_v30 = vpop.f32.mrb[17].mxu1 }
 0x8b3   : > { %v2484_v3 = vadd.f32 %v2483_v30, %v2408_v34 }
 0x8b4   : > { %v2585_v32 = vadd.f32 %v2581_v15, %v2482_v9 }
 0x8b6   : > { %v3072_v19 = vmul.f32 -1.442695, %v2585_v32 }
 0x8b8   : > { %3623 = vpow2.f32 %v3072_v19 }
 0x8c2   : > { %v3624_v12 = vpop.eup %3623 }
 0x8c3   : > { %v2589_v22 = vadd.f32 1.0, %v3624_v12 }
 0x8c5   : > { %3625 = vrcp.f32 %v2589_v22 }
 0x8cf   : > { %v3626_v7 = vpop.eup %3625 }
 0x8d0   : > { %v2592_v11 = vmul.f32 %v3626_v7, %v2583_v36  ;;  %v2595_v38 = vsub.f32 1.0, %v3626_v7  ;;  %v2604_v59 = vmul.f32 %v3626_v7, %v2602_v21 }
 0x8d2   : > { %v2593_v37 = vadd.f32 %v2592_v11, %v2484_v3 }
 0x8d4   : > { %3627 = vtanh.f32 %v2593_v37 }
 0x8de   : > { %v3628_v60 = vpop.eup %3627 }
 0x8df   : > { %2597 = vrot.lane.b32.xlu1 %v3628_v60, %s4310_s15 }
 0x951   : > { %v2598_v48 = vpop.permute.xlu1 %2597 }
 0x952   : > { %v2600_v54 = vmul.f32 %v2598_v48, %v2595_v38 }
 0x954   : > { %v2605_v47 = vadd.f32 %v2604_v59, %v2600_v54 }
 0x956   : > { %2607 = vrot.lane.b32.xlu1 %v2605_v47, %s4310_s15 }
 0x9c8   : > { %v2608_v42 = vpop.permute.xlu1 %2607 }
 0x9c9   : > { %2610 = vst.msk [vmem:[#allocation26] sm:$0xff] %vm763_vm1, %v2608_v42  ;;  %v2614_v16 = vsel %vm763_vm1, %v2608_v42, %v2612_v39 }
 0x9ca   : > { %2615 = vst [vmem:[#allocation3] sm:$0xff] %v2614_v16 }
 0x9cb PF: > { %v2619_v51 = vld [vmem:[%s4774_s29] sm:$0xff]  ;;  %v2620_v10 = vld [vmem:[%s4774_s29 + $0x8] sm:$0xff]  ;;  %v2621_v23 = vld [vmem:[%s4774_s29 + $0x10] sm:$0xff]  ;;  %v4311_v14 = vmov 0.0|0.0   ;;  %vm2646_vm13 = vcmask 261120   ;;  %s4312_s2 = smov [#allocation26]  }
 0x9cc   : > { %3353 = vmatprep.subr.bf16.mxu0 %v4311_v14  ;;  %v3354_v18 = vpack.c.bf16 %v2620_v10, %v2619_v51  ;;  %v2622_v2 = vld [vmem:[%s4774_s29 + $0x18] sm:$0xff]  ;;  %v2623_v31 = vld [vmem:[%s4774_s29 + $0x20] sm:$0xff]  ;;  %v2624_v43 = vld [vmem:[%s4774_s29 + $0x28] sm:$0xff]  ;;  %s2746_s12 = sshll.u32 %s4312_s2, 4  ;;  %p5590_p1 = scmp.eq.s32.totalorder %s4422_s28, 1  ;;  %s2747_s12 = int_to_ptr.vmem [resolvable:$true] %s2746_s12 }
 0x9cd   : > { %v3357_v56 = vpack.c.bf16 %v2622_v2, %v2621_v23  ;;  %v2618_v44 = vld [vmem:[#allocation3 + $0x8] sm:$0xff]  ;;  %v3360_v50 = vpack.c.bf16 %v2624_v43, %v2623_v31  ;;  %v2626_v5 = vld [vmem:[%s4774_s29 + $0x38] sm:$0xff]  ;;  %v2627_v20 = vld [vmem:[%s4774_s29 + $0x40] sm:$0xff]  ;;  %s4144_s13 = scalar_lea.vmem %s2747_s12, 128  ;;  %p4151_p5 = scmp.lt.s32.totalorder %s2747_s12, %s2747_s12 }
 0x9ce   : > { %3355 = vmatpush1.bf16.msra.mxu0 %v3354_v18  ;;  %3074 = vmatprep.mubr.msk.f32.mxu0 %vm2646_vm13, %v2618_v44  ;;  %v2625_v62 = vld [vmem:[%s4774_s29 + $0x30] sm:$0xff]  ;;  %v2628_v63 = vld [vmem:[%s4774_s29 + $0x48] sm:$0xff]  ;;  %v2630_v17 = vld [vmem:[%s4774_s29 + $0x58] sm:$0xff]  ;;  %p4145_p11 = scmp.ne.s32.totalorder %s2747_s12, %s4144_s13  ;;  %p4152_p8 = scmp.lt.s32.totalorder %s4144_s13, %s4144_s13 }
 0x9cf   : > { %3356 = vmatprep.subr.bf16.mxu0 %v4311_v14  ;;  %v3363_v26 = vpack.c.bf16 %v2626_v5, %v2625_v62  ;;  %v3366_v52 = vpack.c.bf16 %v2628_v63, %v2627_v20  ;;  %v2629_v6 = vld [vmem:[%s4774_s29 + $0x50] sm:$0xff]  ;;  %v2631_v57 = vld [vmem:[%s4774_s29 + $0x60] sm:$0xff]  ;;  %v2632_v45 = vld [vmem:[%s4774_s29 + $0x68] sm:$0xff] }
 0x9d0   : > { %v3369_v55 = vpack.c.bf16 %v2630_v17, %v2629_v6  ;;  %v3372_v53 = vpack.c.bf16 %v2632_v45, %v2631_v57  ;;  %v2633_v41 = vld [vmem:[%s4774_s29 + $0x70] sm:$0xff]  ;;  %v2634_v46 = vld [vmem:[%s4774_s29 + $0x78] sm:$0xff]  ;;  %v2635_v58 = vld [vmem:[%s4774_s29 + $0x80] sm:$0xff]  ;;  %p4146_p10 = pnand %p4145_p11, %p5590_p1  ;;  %p4153_p7 = por %p4152_p8, %p4151_p5 }
 0x9d1   : > { %v3375_v35 = vpack.c.bf16 %v2634_v46, %v2633_v41  ;;  %v2636_v61 = vld [vmem:[%s4774_s29 + $0x88] sm:$0xff]  ;;  %v2637_v24 = vld [vmem:[%s4774_s29 + $0x90] sm:$0xff]  ;;  %v2638_v25 = vld [vmem:[%s4774_s29 + $0x98] sm:$0xff] }
 0x9d2   : > { %3358 = vmatpush1.bf16.msra.mxu0 %v3357_v56  ;;  %v3378_v1 = vpack.c.bf16 %v2636_v61, %v2635_v58  ;;  %v3381_v4 = vpack.c.bf16 %v2638_v25, %v2637_v24  ;;  %v2617_v0 = vld [vmem:[#allocation3] sm:$0xff]  ;;  %p4147_p0 = pneg %p4146_p10 }
 0x9d3   : > { %3359 = vmatprep.subr.bf16.mxu0 %v4311_v14 }
 0x9d4   : > { %p4154_p3 = pnand %p4153_p7, %p4147_p0 }
 0x9d6   : > { %3361 = vmatpush1.bf16.msra.mxu0 %v3360_v50 }
 0x9d7   : > { %3362 = vmatprep.subr.bf16.mxu0 %v4311_v14 }
 0x9da   : > { %3364 = vmatpush1.bf16.msra.mxu0 %v3363_v26 }
 0x9db   : > { %3365 = vmatprep.subr.bf16.mxu0 %v4311_v14 }
 0x9de   : > { %3367 = vmatpush1.bf16.msra.mxu0 %v3366_v52 }
 0x9df   : > { %3368 = vmatprep.subr.bf16.mxu0 %v4311_v14 }
 0x9e2   : > { %3370 = vmatpush1.bf16.msra.mxu0 %v3369_v55 }
 0x9e3   : > { %3371 = vmatprep.subr.bf16.mxu0 %v4311_v14 }
 0x9e6   : > { %3373 = vmatpush1.bf16.msra.mxu0 %v3372_v53 }
 0x9e7   : > { %3374 = vmatprep.subr.bf16.mxu0 %v4311_v14 }
 0x9ea   : > { %3376 = vmatpush1.bf16.msra.mxu0 %v3375_v35 }
 0x9eb   : > { %3377 = vmatprep.subr.bf16.mxu0 %v4311_v14 }
 0x9ee   : > { %3379 = vmatpush1.bf16.msra.mxu0 %v3378_v1 }
 0x9ef   : > { %3380 = vmatprep.subr.bf16.mxu0 %v4311_v14 }
 0x9f2   : > { %3382 = vmatpush1.bf16.msra.mxu0 %v3381_v4 }
 0x9f5   : > { %2715 = vmatmul.mubr.f32.vlgmr.msra.gmra.mrb[0].mxu0 %v2617_v0 }
 0x9f6   : > { %4157 = shalt.err (!%p4154_p3)
}
 0x9f7   : > { %s5591_s6 = sld [smem:[#allocation78_spill]]  ;;  %p5592_p2 = pmov %p5590_p1 }
 0x9fd   : > { %s4158_s3 = scalar_lea.hbm %s5591_s6, 128 }
 0x9fe   : > { %p4159_p9 = scmp.ne.s32.totalorder %s5591_s6, %s4158_s3  ;;  %p4164_p12 = scmp.lt.u32.totalorder %s4158_s3, %s5591_s6 }
 0xa00   : > { %p4160_p6 = pnand %p4159_p9, %p5592_p2 }
 0xa02   : > { %p4161_p13 = pneg %p4160_p6 }
 0xa04   : > { %p4166_p4 = pnand %p4164_p12, %p4161_p13 }
 0xa06   : > { %4169 = shalt.err (!%p4166_p4)
}
 0xa07   : > { %p5593_p11 = pmov %p5590_p1  ;;  %s5594_s21 = scalar_lea.vmem [#allocation24], %s4771_s20 }
 0xa08   : > { %v3073_v8 = vld [vmem:[%s5594_s21] ss:$0 sm:$0xff]  ;;  %s3076_s16 = sshll.u32 %s4422_s28, 7  ;;  %s2735_s27 = sshll.u32 %s4782_s18, 4  ;;  %s5432_s27 = int_to_ptr.vmem [resolvable:$true] %s2735_s27 }
 0xa09   : > { %3427 = dma.vmem_to_hbm [thread:$0]  (%p5593_p11), %s2747_s12, 128, %s5591_s6, [#allocation27]  }
 0xa0a   : > { %s5595_s4 = sld [smem:[#allocation77_spill]]  ;;  %s2722_s2 = scalar_lea.sflag [#allocation9], %s4771_s20 }
 0xa0b   : > { %s4170_s12 = scalar_lea.vmem %s5432_s27, 128  ;;  %p5596_p10 = scmp.ne.s32.totalorder %s5548_s17, 0 }
 0xa0c   : > { %p4171_p1 = scmp.ne.s32.totalorder %s5432_s27, %s4170_s12  ;;  %s4313_s13 = smov [#allocation25]  }
 0xa0d   : > { %s4174_s29 = sshll.u32 %s4313_s13, 4  ;;  %s4175_s29 = int_to_ptr.vmem [resolvable:$false] %s4174_s29 }
 0xa0e   : > { %p4172_p0 = pnand %p4171_p1, %p5596_p10  ;;  %s4176_s9 = scalar_lea.vmem %s4175_s29, 256 }
 0xa0f   : > { %p4177_p8 = scmp.lt.s32.totalorder %s5432_s27, %s4175_s29  ;;  %p4178_p7 = scmp.lt.s32.totalorder %s4176_s9, %s4170_s12 }
 0xa10   : > { %s5430_s15 = scalar_lea.hbm %s5595_s4, %s3076_s16  ;;  %p4173_p5 = pneg %p4172_p0 }
 0xa11   : > { %p4179_p3 = por %p4178_p7, %p4177_p8 }
 0xa13   : > { %p4180_p9 = pnand %p4179_p3, %p4173_p5 }
 0xac8   : > { %v2716_v27 = vpop.f32.mrb[0].mxu0 }
 0xac9   : > { %v2717_v28 = vadd.f32 %v3073_v8, %v2716_v27  ;;  %v2718_v29 = vpop.f32.mrb[1].mxu0 }
 0xacb   : > { %2720 = vst [vmem:[%s4782_s18] sm:$0xff] %v2717_v28 }
 0xacc   : > { %4183 = shalt.err (!%p4180_p9)
}
 0xacd   : > { %s4184_s20 = scalar_lea.hbm %s5430_s15, 128  ;;  %s4188_s5 = scalar_lea.hbm %s5595_s4, 256 }
 0xace   : > { %p4185_p2 = scmp.ne.s32.totalorder %s5430_s15, %s4184_s20  ;;  %p4189_p12 = scmp.lt.u32.totalorder %s5430_s15, %s5595_s4 }
 0xacf   : > { %p4190_p4 = scmp.lt.u32.totalorder %s4188_s5, %s4184_s20  ;;  %p4192_p1 = scmp.lt.u32.totalorder %s4184_s20, %s5430_s15 }
 0xad0   : > { %p4186_p6 = pnand %p4185_p2, %p5596_p10 }
 0xad1   : > { %p4191_p11 = por %p4190_p4, %p4189_p12 }
 0xad2   : > { %p4187_p13 = pneg %p4186_p6 }
 0xad3   : > { %p4193_p0 = por %p4192_p1, %p4191_p11 }
 0xad5   : > { %p4194_p5 = pnand %p4193_p0, %p4187_p13 }
 0xad7   : > { %4197 = shalt.err (!%p4194_p5)
}
 0xad8   : > { %3425 = dma.vmem_to_hbm [thread:$0]  (%p5596_p10), %s5432_s27, 128, %s5430_s15, %s2722_s2  }
 0xad9   : > { %p5597_p8 = scmp.eq.s32.totalorder %s4422_s28, 1 }
 0xadb   : > { %4257 = dma.done.wait (%p5597_p8), [#allocation27], 128   ;;  %p5598_p7 = pmov %p5597_p8 }
 0xadd   : > { %4259 = vsyncadd (%p5598_p7), [#allocation27], 4294967168 }
 0xade PF: > { %s5599_s19 = sld [smem:[#allocation66_spill]]  ;;  %s2762_s14 = sand.u32 1, %s4266_s23  }
 0xadf   : > { %p5601_p9 = scmp.ge.s32.totalorder %s4278_s0, 2  ;;  %s2763_s11 = scalar_lea.sflag [#allocation9], %s2762_s14 }
 0xae4   : > { %p5600_p3 = scmp.ne.s32.totalorder %s5599_s19, 0 }
 0xae6   : > { %p3467_p2 = pnand %p5601_p9, %p5600_p3 }
 0xae8   : > { %4261 = dma.done.wait (!%p3467_p2), %s2763_s11, 128  }
 0xae9   : > { %4263 = vsyncadd (!%p3467_p2), %s2763_s11, 4294967168  ;;  %s5602_s0 = sld [smem:[#allocation64_spill]]  ;;  %s5603_s17 = sld [smem:[#allocation65_spill]] }
 0xaea   : > { %s5604_s23 = smov %s4270_s24  ;;  %s5605_s24 = smov %s4274_s25 }
 0xaef   : > { %p38_p10 = scmp.ge.s32.totalorder %s5602_s0, 4   ;;  %s5606_s25 = smov %s5603_s17 }
 0xaf1   :  { %40 = sbr.rel (!%p38_p10) target bundleno = 30 (0x1e), region = 230 }
 0xaf8   :  { %2768 = vsyncpa [#allocation8], 1 }
 0xaf9   :  { %2770 = vsyncpa [#allocation8 + $0x1], 1 }
 0xafa   :  { %2771 = vsyncpa [#allocation11], 1 }
 0xafb   :  { %2772 = vsyncpa [#allocation14], 1 }
 0xafc   :  { %2773 = vsyncpa [#allocation17], 1 }
 0xafd   :  { %2774 = vsyncpa [#allocation20], 1 }
 0xafe   :  { %2775 = vsyncpa [#allocation23], 1 }
 0xaff   :  { %2777 = vsyncpa [#allocation23 + $0x1], 1 }
 0xb00   :  { %2778 = vsyncpa [#allocation9], 1 }
 0xb01   :  { %2780 = vsyncpa [#allocation9 + $0x1], 1 }
 0xb02   :  { %2781 = vsyncpa [#allocation27], 1 }
 0xb03   :  { %2782 = vsyncmov [#allocation4] }
 0xb06   :  { %s2783_s28 = vpop.sfrf %2782 }
 0xb07   :  { %p3081_p6 = scmp.ne.s32.totalorder %s2783_s28, 0 }
 0xb09   :  { %2787 = shalt.err (%p3081_p6)  }
 0xb0a   :  { %2789 = vsyncmov [#allocation4 + $0x1] }
 0xb0d   :  { %s2790_s21 = vpop.sfrf %2789 }
 0xb0e   :  { %p3082_p13 = scmp.ne.s32.totalorder %s2790_s21, 0 }
 0xb10   :  { %2794 = shalt.err (%p3082_p13)  }
 0xb11   :  { %2796 = vsyncmov [#allocation4 + $0x2] }
 0xb14   :  { %s2797_s8 = vpop.sfrf %2796 }
 0xb15   :  { %p3083_p12 = scmp.ne.s32.totalorder %s2797_s8, 0 }
 0xb17   :  { %2801 = shalt.err (%p3083_p12)  }
 0xb18   :  { %2803 = vsyncmov [#allocation4 + $0x3] }
 0xb1b   :  { %s2804_s10 = vpop.sfrf %2803 }
 0xb1c   :  { %p3084_p4 = scmp.ne.s32.totalorder %s2804_s10, 0 }
 0xb1e   :  { %2808 = shalt.err (%p3084_p4)  }
 0xb1f   :  { %2810 = vsyncmov [#allocation4 + $0x4] }
 0xb22   :  { %s2811_s23 = vpop.sfrf %2810 }
 0xb23   :  { %p3085_p11 = scmp.ne.s32.totalorder %s2811_s23, 0 }
 0xb25   :  { %2815 = shalt.err (%p3085_p11)  }
 0xb26   :  { %2817 = vsyncmov [#allocation4 + $0x5] }
 0xb29   :  { %s2818_s24 = vpop.sfrf %2817 }
 0xb2a   :  { %p3086_p1 = scmp.ne.s32.totalorder %s2818_s24, 0 }
 0xb2c   :  { %2822 = shalt.err (%p3086_p1)  }
 0xb2d   :  { %2824 = vsyncmov [#allocation4 + $0x6] }
 0xb30   :  { %s2825_s25 = vpop.sfrf %2824 }
 0xb31   :  { %p3087_p0 = scmp.ne.s32.totalorder %s2825_s25, 0 }
 0xb33   :  { %2829 = shalt.err (%p3087_p0)  }
 0xb34   :  { %2831 = vsyncmov [#allocation4 + $0x7] }
 0xb37   :  { %s2832_s0 = vpop.sfrf %2831 }
 0xb38   :  { %p3088_p5 = scmp.ne.s32.totalorder %s2832_s0, 0 }
 0xb3a   :  { %2836 = shalt.err (%p3088_p5)  }

</bundles_post_ra>
